<compile_context>
chip_gen: v5e
topology: v5e:2x2
jax: 0.10.0
libtpu: 0.0.40
codegen_flags: <defaults>
</compile_context>

<pallas_src>
import functools
import math

import jax
import jax.numpy as jnp
from jax.experimental import pallas as pl
from jax.experimental.pallas import tpu as pltpu


# ------------------------------ hardware caps -------------------------------- #

def _tpu_caps():
    """Return (physical VMEM bytes, multi-TensorCore?, device-kind str) with safe fallbacks."""
    kind = ""
    try:
        kind = str(getattr(jax.devices()[0], "device_kind", "") or "").lower()
    except Exception:
        pass
    is_v7 = ("v7" in kind) or ("7x" in kind)
    vmem_cap = (64 if is_v7 else 128) * 1024 * 1024
    try:
        vmem_cap = int(pltpu.get_tpu_info().vmem_capacity_bytes)
    except Exception:
        pass
    multi_core = is_v7 or ("v4" in kind) or ("v5p" in kind)
    return vmem_cap, multi_core, kind


# ------------------------------ Pallas kernel -------------------------------- #

def _conv1x1_silu_kernel(x_ref, w_ref, b_ref, o_ref, *, exp_bf16):
    # (tm, C_in) @ (C_in, tn) on the MXU, f32 accumulation.
    y = jnp.dot(x_ref[...], w_ref[...], preferred_element_type=jnp.float32)
    y = y + b_ref[...]                          # bias broadcast over rows
    # SiLU = y * sigmoid(y).  sigmoid built from an EUP exp + the cheap
    # approximate reciprocal (vrcp) instead of a full divide so the elementwise
    # tail never becomes the binding VLIW slot (relevant on v7x at 3.2 TB/s).
    if exp_bf16:                                # v6e/v7x bf16 EUP path (bf16 output only)
        e = jnp.exp((-y).astype(jnp.bfloat16)).astype(jnp.float32)
    else:                                       # v5e has no bf16 EUP -> keep f32 tail
        e = jnp.exp(-y)
    sig = pl.reciprocal(1.0 + e, approx=True)
    o_ref[...] = (y * sig).astype(o_ref.dtype)


def _pick_tm(M, tm_req, multi_core):
    """Row tile: as large as possible; the >=4-grid-step shrink only on 2-TC chips."""
    if tm_req >= M:
        return M                                # single full-extent block (always legal)
    tm = max(8, (tm_req // 8) * 8)
    if multi_core:
        # keep >=4 grid steps so both TensorCores get work, but never drop
        # below 256 rows (85% -> 63% HBM-roofline cliff measured at 512->256).
        while M // tm < 4 and tm >= 512:
            tm //= 2
    return tm


def conv1x1_silu(x2d, w, b, *, tm=None, out_dtype=None, max_tn=None):
    """Fused 1x1 conv + bias + SiLU.

    x2d: (M, C_in), w: (C_in, N_out) pre-transposed, b: (N_out,) or (1, N_out).
    Returns (M, N_out) in out_dtype (default: input dtype; pass jnp.bfloat16 to
    halve the writeback bytes, accumulation stays f32 in-kernel).
    """
    M, C_in = x2d.shape
    assert w.shape[0] == C_in, (w.shape, C_in)
    N_out = w.shape[1]
    out_dtype = x2d.dtype if out_dtype is None else out_dtype

    in_bytes = jnp.dtype(x2d.dtype).itemsize
    w_bytes = jnp.dtype(w.dtype).itemsize
    out_bytes = jnp.dtype(out_dtype).itemsize

    vmem_cap, multi_core, kind = _tpu_caps()
    # Never request more scoped VMEM than the chip has (v7x: 64 MiB physical).
    budget = min((vmem_cap * 3) // 4, 100 * 1024 * 1024)

    if tm is None:
        tm = 512 if multi_core else 1024        # single-core chips: bigger tile, no sharding need
    tm = _pick_tm(M, tm, multi_core)

    def vmem_need(tm_, tn_):
        nbuf_w = 1 if tn_ >= N_out else 2       # weight/bias single-buffered when grid-invariant
        return (2 * tm_ * C_in * in_bytes       # double-buffered activation tiles
                + 2 * tm_ * tn_ * out_bytes     # double-buffered output tiles
                + nbuf_w * (C_in + 8) * tn_ * w_bytes
                + 2 * tm_ * tn_ * 4)            # f32 matmul / SiLU temporaries

    # Prefer tiling N_out over shrinking tm when VMEM is tight (v7x, large channels).
    tn_cands = [N_out] + [t for t in (2048, 1024, 512, 256, 128) if t < N_out]
    if max_tn is not None:
        tn_cands = [t for t in tn_cands if t <= max_tn] or [tn_cands[-1]]
    tn = tn_cands[0]
    for t in tn_cands:
        tn = t
        if vmem_need(tm, tn) <= budget:
            break
    while vmem_need(tm, tn) > budget and tm > 256:
        tm = max(256, ((tm // 2) // 8) * 8)

    ni = pl.cdiv(M, tm)                         # partial last row block handled by Pallas masking
    nj = pl.cdiv(N_out, tn)                     # partial last column block likewise

    b2 = b.reshape(1, N_out)
    use_bf16_exp = (jnp.dtype(out_dtype) == jnp.dtype(jnp.bfloat16)
                    and any(t in kind for t in ("v6", "v7", "7x")))
    kernel = functools.partial(_conv1x1_silu_kernel, exp_bf16=use_bf16_exp)

    cost = pl.CostEstimate(
        flops=2 * M * C_in * N_out,
        transcendentals=2 * M * N_out,          # exp + reciprocal
        bytes_accessed=(nj * M * C_in * in_bytes
                        + (C_in + 1) * N_out * w_bytes
                        + M * N_out * out_bytes),
    )

    vmem_limit = min(max(2 * vmem_need(tm, tn), 32 * 1024 * 1024), budget)

    # Grid-invariant weight/bias stay single-buffered; double-buffer when N-chunked.
    w_mode = pl.Buffered(1) if nj == 1 else pl.Buffered(2)

    out = pl.pallas_call(
        kernel,
        out_shape=jax.ShapeDtypeStruct((M, N_out), out_dtype),
        grid_spec=pltpu.PrefetchScalarGridSpec(
            num_scalar_prefetch=0,
            grid=(nj, ni),                      # j outer: weight chunk fetched once per j
            in_specs=[
                pl.BlockSpec((tm, C_in), lambda j, i: (i, 0)),   # streamed activations
                pl.BlockSpec((C_in, tn), lambda j, i: (0, j), pipeline_mode=w_mode),
                pl.BlockSpec((1, tn), lambda j, i: (0, j), pipeline_mode=w_mode),
            ],
            out_specs=pl.BlockSpec((tm, tn), lambda j, i: (i, j)),
        ),
        compiler_params=pltpu.CompilerParams(
            dimension_semantics=("parallel", "parallel"),
            vmem_limit_bytes=vmem_limit,
        ),
        cost_estimate=cost,
    )(x2d, w, b2)
    return out


# ---------------------------- Module-level wrapper ---------------------------- #

def init_spatial_upsample2x_params(key, dim, dim_out=None):
    """Deterministic re-implementation of SpatialUpsample2x.init_conv_.

    Returns the weight pre-transposed as (C_in, 4*C_out) and the bias as
    (1, 4*C_out) so no per-call transpose/reshape is needed.
    """
    dim_out = dim if dim_out is None else dim_out
    # kaiming_uniform_ on (dim_out, dim, 1, 1): fan_in = dim, gain = sqrt(2)
    bound = math.sqrt(2.0) * math.sqrt(3.0 / dim)
    w_base = jax.random.uniform(
        key, (dim_out, dim), minval=-bound, maxval=bound, dtype=jnp.float32)
    w_full = jnp.repeat(w_base, 4, axis=0)          # (4*dim_out, dim); o = c*4 + p1*2 + p2
    w_t = jnp.transpose(w_full)                     # (dim, 4*dim_out), kernel layout
    bias = jnp.zeros((1, 4 * dim_out), dtype=jnp.float32)
    return w_t, bias


def spatial_upsample2x(x, w_t, bias, *, tm=None, out_dtype=None):
    """x: (B, C, T, H, W) -> (B, C_out, T, 2H, 2W)."""
    B, C, T, H, W = x.shape
    N_out = w_t.shape[1]
    C_out = N_out // 4

    # Single transpose to channels-last, then flatten rows: (M, C), M = B*T*H*W.
    x_rows = jnp.transpose(x, (0, 2, 3, 4, 1)).reshape(B * T * H * W, C)

    # Fused 1x1 conv + bias + SiLU on MXU/VPU/EUP.
    y = conv1x1_silu(x_rows, w_t, bias, tm=tm, out_dtype=out_dtype)   # (M, 4*C_out)

    # Pixel shuffle + NCTHW in ONE fused XLA reshape/transpose/reshape pass
    # (runs in the kernel's output dtype; see TODO(synk) about fusing in-kernel).
    y = y.reshape(B, T, H, W, C_out, 2, 2)          # (b, t, h, w, c, p1, p2)
    y = jnp.transpose(y, (0, 4, 1, 2, 5, 3, 6))     # (b, c, t, h, p1, w, p2)
    return y.reshape(B, C_out, T, 2 * H, 2 * W)


# ---------------------------------- Reference --------------------------------- #

def spatial_upsample2x_ref(x, w_t, bias):
    B, C, T, H, W = x.shape
    N_out = w_t.shape[1]
    C_out = N_out // 4
    y = jnp.einsum('bcthw,co->bothw', x, w_t, precision='highest')
    y = y + bias.reshape(1, N_out, 1, 1, 1)
    y = y * jax.nn.sigmoid(y)
    # rearrange 'b (c p1 p2) t h w -> b c t (h p1) (w p2)'
    y = y.reshape(B, C_out, 2, 2, T, H, W)
    y = jnp.transpose(y, (0, 1, 4, 5, 2, 6, 3)).reshape(B, C_out, T, 2 * H, 2 * W)
    return y


# ------------------------------------ Main ------------------------------------ #

if __name__ == "__main__":
    key = jax.random.PRNGKey(0)
    k1x, k1w, k2x, k2w, k3x, k3w, k3b = jax.random.split(key, 7)

    fwd = jax.jit(spatial_upsample2x, static_argnames=("tm", "out_dtype"))

    # Tolerances for f32 tests are set by the approximate EUP reciprocal (vrcp)
    # used for the SiLU sigmoid (~1e-4..1e-3 relative), not by the matmul.

    # --- Test 1: lane-dense channels (N_out = 128), M = 2048 -------------------
    B, C, T, H, W = 2, 32, 4, 16, 16
    x = jax.random.normal(k1x, (B, C, T, H, W), dtype=jnp.float32)
    w_t, bias = init_spatial_upsample2x_params(k1w, C, C)

    out = jax.block_until_ready(fwd(x, w_t, bias))
    ref = spatial_upsample2x_ref(x, w_t, bias)
    assert out.shape == (B, C, T, 2 * H, 2 * W), out.shape
    assert jnp.allclose(out, ref, atol=5e-3, rtol=5e-3), "mismatch vs reference (f32)"

    # --- Test 2: ragged row count -> masked partial last row block -------------
    B2, C2, T2, H2, W2 = 1, 32, 3, 10, 10           # M = 300, not a tile multiple
    x2 = jax.random.normal(k2x, (B2, C2, T2, H2, W2), dtype=jnp.float32)
    w2, b2 = init_spatial_upsample2x_params(k2w, C2, C2)

    out2 = jax.block_until_ready(fwd(x2, w2, b2))
    ref2 = spatial_upsample2x_ref(x2, w2, b2)
    assert out2.shape == (B2, C2, T2, 2 * H2, 2 * W2), out2.shape
    assert jnp.allclose(out2, ref2, atol=5e-3, rtol=5e-3), "mismatch vs reference (ragged)"

    # --- Test 3: bf16 writeback (halves output HBM bytes; f32 accumulation) ----
    out_bf16 = jax.block_until_ready(fwd(x, w_t, bias, out_dtype=jnp.bfloat16))
    assert out_bf16.dtype == jnp.bfloat16
    assert jnp.allclose(out_bf16.astype(jnp.float32), ref, atol=3e-2, rtol=2e-2), \
        "mismatch vs reference (bf16 output)"

    # --- Test 4: N_out tiling path (2-D grid, masked tail column block) --------
    xk = jax.random.normal(k3x, (300, 64), dtype=jnp.float32)
    wk = jax.random.normal(k3w, (64, 384), dtype=jnp.float32) * 0.1
    bk = jax.random.normal(k3b, (384,), dtype=jnp.float32) * 0.1
    yk = jax.block_until_ready(conv1x1_silu(xk, wk, bk, max_tn=256))
    yr = jnp.dot(xk, wk, precision='highest') + bk
    yr = yr * jax.nn.sigmoid(yr)
    assert yk.shape == (300, 384), yk.shape
    assert jnp.allclose(yk, yr, atol=5e-3, rtol=5e-3), "mismatch vs reference (N chunks)"

    print("KERNEL_OK")
</pallas_src>

<mosaic_0001>
module attributes {stable_mosaic.version = 11 : i64} {
  func.func @_conv1x1_silu_kernel(%arg0: i32, %arg1: i32, %arg2: memref<1024x32xf32, #tpu.memory_space<vmem>>, %arg3: memref<32x128xf32, #tpu.memory_space<vmem>>, %arg4: memref<1x128xf32, #tpu.memory_space<vmem>>, %arg5: memref<1024x128xf32, #tpu.memory_space<vmem>>) attributes {dimension_semantics = [#tpu.dimension_semantics<parallel>, #tpu.dimension_semantics<parallel>], iteration_bounds = array<i64: 1, 2>, scalar_prefetch = 0 : i64, scratch_operands = 0 : i64, tpu.core_type = #tpu.core_type<tc>, window_params = [{transform_indices = @transform_0, window_bounds = array<i64: 1024, 32>}, {pipeline_mode = #tpu.pipeline_mode<synchronous>, transform_indices = @transform_1, window_bounds = array<i64: 32, 128>}, {pipeline_mode = #tpu.pipeline_mode<synchronous>, transform_indices = @transform_2, window_bounds = array<i64: 1, 128>}, {transform_indices = @transform_3, window_bounds = array<i64: 1024, 128>}]} {
    %c0 = arith.constant 0 : index
    %c0_0 = arith.constant 0 : index
    %0 = vector.load %arg2[%c0, %c0_0] : memref<1024x32xf32, #tpu.memory_space<vmem>>, vector<1024x32xf32>
    %c0_1 = arith.constant 0 : index
    %c0_2 = arith.constant 0 : index
    %1 = vector.load %arg3[%c0_1, %c0_2] : memref<32x128xf32, #tpu.memory_space<vmem>>, vector<32x128xf32>
    %cst = arith.constant dense<0.000000e+00> : vector<1024x128xf32>
    %2 = tpu.matmul %0, %1, %cst {dimension_numbers = #tpu.dot_dimension_numbers<[1], [0], [0], [1], [0, 0, 1, 1], [], []>} : vector<1024x32xf32>, vector<32x128xf32>, vector<1024x128xf32> -> vector<1024x128xf32>
    %c0_3 = arith.constant 0 : index
    %c0_4 = arith.constant 0 : index
    %3 = vector.load %arg4[%c0_3, %c0_4] : memref<1x128xf32, #tpu.memory_space<vmem>>, vector<1x128xf32>
    %4 = vector.broadcast %3 : vector<1x128xf32> to vector<1024x128xf32>
    %5 = arith.addf %2, %4 : vector<1024x128xf32>
    %cst_5 = arith.constant 0.000000e+00 : f32
    %6 = vector.broadcast %cst_5 : f32 to vector<1024x128xf32>
    %7 = arith.subf %6, %5 : vector<1024x128xf32>
    %8 = math.exp %7 : vector<1024x128xf32>
    %cst_6 = arith.constant 1.000000e+00 : f32
    %9 = vector.broadcast %cst_6 : f32 to vector<1024x128xf32>
    %10 = arith.addf %9, %8 : vector<1024x128xf32>
    %11 = tpu.reciprocal %10 {approx = true} : vector<1024x128xf32> -> vector<1024x128xf32>
    %12 = arith.mulf %5, %11 : vector<1024x128xf32>
    %c0_7 = arith.constant 0 : index
    %c0_8 = arith.constant 0 : index
    %13 = vector.load %arg5[%c0_7, %c0_8] : memref<1024x128xf32, #tpu.memory_space<vmem>>, vector<1024x128xf32>
    tpu.vector_store %arg5[%c0_7, %c0_8], %12 {strides = array<i32>} : memref<1024x128xf32, #tpu.memory_space<vmem>>, vector<1024x128xf32>,
    return
  }
  func.func @transform_0(%arg0: i32, %arg1: i32) -> (i32, i32) {
    %c0_i32 = arith.constant 0 : i32
    %c0_i32_0 = arith.constant 0 : i32
    return %arg1, %c0_i32 : i32, i32
  }
  func.func @transform_1(%arg0: i32, %arg1: i32) -> (i32, i32) {
    %c0_i32 = arith.constant 0 : i32
    %c0_i32_0 = arith.constant 0 : i32
    return %c0_i32, %arg0 : i32, i32
  }
  func.func @transform_2(%arg0: i32, %arg1: i32) -> (i32, i32) {
    %c0_i32 = arith.constant 0 : i32
    %c0_i32_0 = arith.constant 0 : i32
    return %c0_i32, %arg0 : i32, i32
  }
  func.func @transform_3(%arg0: i32, %arg1: i32) -> (i32, i32) {
    %c0_i32 = arith.constant 0 : i32
    return %arg1, %arg0 : i32, i32
  }
}

</mosaic_0001>

<bundles_post_ra>
// kernel: spatial_upsample2x.1
= control target key start
LH: loop header
LB: loop body
LE: loop exit
PB: predicated region body
PF: predicated region fallthrough
CT: control target
= control target key end

     0   :  { %8 = vsyncpa [#allocation3], 0  ;;  %s4270_s0 = inlined_call_operand.hbm [shape: f32[2048,32], index: 0, kind: input, shape index: {}]   ;;  %s4271_s1 = inlined_call_operand.hbm [shape: f32[32,128], index: 1, kind: input, shape index: {}]   ;;  %s4272_s2 = inlined_call_operand.hbm [shape: f32[1,128], index: 2, kind: input, shape index: {}]   ;;  %s4273_s3 = inlined_call_operand.vmem [shape: f32[2048,128], index: 3, kind: output, shape index: {}]  }
   0x1   :  { %10 = vsyncpa [#allocation3 + $0x1], 0 }
   0x2   :  { %11 = vsyncpa [#allocation5], 0  ;;  %s3106_s12 = smov 0   ;;  %s3108_s13 = smov 0  }
   0x3   :  { %s3110_s14 = smov 0   ;;  %s3112_s15 = smov 0  }
   0x4   :  { %s3114_s16 = smov 0   ;;  %s3116_s17 = smov 0  }
   0x5 LB: > { %s2185_s18 = sadd.s32 4294967295, %s3080_s17   ;;  %p49_p0 = scmp.ne.s32.totalorder %s3064_s13, %s3060_s12  ;;  %s3080_s17 = sphi %s3116_s17, %s17_s17   ;;  %s3076_s16 = sphi %s3114_s16, %s4283_s16   ;;  %s3072_s15 = sphi %s3112_s15, %s4282_s15   ;;  %s3068_s14 = sphi %s3110_s14, %s4281_s14   ;;  %s3064_s13 = sphi %s3108_s13, %s4280_s13   ;;  %s3060_s12 = sphi %s3106_s12, %s4279_s12  }
   0x6   : > { %p3136_p1 = scmp.eq.s32.totalorder %s2185_s18, 0  ;;  %p2187_p2 = scmp.ge.s32.totalorder %s3080_s17, 1 }
   0x7   : > { %p140_p3 = scmp.lt.s32.totalorder %s3080_s17, 3  ;;  %s153_s23 = sshll.u32 %s4271_s1, 4  ;;  %s154_s23 = int_to_ptr.hbm [resolvable:$true] %s153_s23 }
   0x8   : > { %p3144_p4 = por %p3136_p1, %p49_p0  ;;  %s3082_s25 = smov [#allocation4]  }
   0x9   : > { %p3151_p5 = pnand %p2187_p2, %p140_p3  ;;  %s155_s26 = sshll.u32 %s3082_s25, 4  ;;  %s156_s26 = int_to_ptr.vmem [resolvable:$true] %s155_s26 }
   0xa   : > { %s169_s29 = sshll.u32 %s4272_s2, 4  ;;  %s3083_s30 = smov 128   ;;  %s170_s29 = int_to_ptr.hbm [resolvable:$true] %s169_s29 }
   0xb   : > { %p2353_p6 = pneg %p3151_p5  ;;  %s3084_s4 = smov 8  }
   0xc   : > { %s3085_s5 = smov [#allocation6]   ;;  %s26_s7 = sadd.s32 1, %s3076_s16 }
   0xd   : > { %p2354_p7 = pnand %p2353_p6, %p3136_p1  ;;  %s171_s6 = sshll.u32 %s3085_s5, 4  ;;  %s172_s6 = int_to_ptr.vmem [resolvable:$true] %s171_s6 }
   0xe   : > { %s36_s8 = sadd.s32 1, %s3068_s14  ;;  %p27_p8 = scmp.ge.s32.totalorder %s26_s7, 2 }
   0xf   : > { %2356 = dma.hbm_to_vmem [thread:$0]  (!%p2354_p7), %s154_s23, 512, %s156_s26, [#allocation5], %s3083_s30, %s3083_s30, %s3084_s4  }
  0x10   : > { %2359 = dma.hbm_to_vmem [thread:$0]  (!%p2354_p7), %s170_s29, 16, %s172_s6, [#allocation5]  }
  0x11   : > { %p43_p9 = scmp.ne.s32.totalorder %s3068_s14, %s3064_s13  ;;  %p44_p10 = scmp.eq.s32.totalorder %s3080_s17, 0 }
  0x12   : > { %p2366_p11 = scmp.lt.s32.totalorder %s3080_s17, 2  ;;  %s4285_s7 = smov (%p27_p8, %s26_s7), 0 }
  0x13   : > { %p3173_p12 = por %p44_p10, %p43_p9  ;;  %s182_s10 = sand.u32 1, %s3068_s14  }
  0x14   : > { %s33_s11 = ssub.s32 %s3076_s16, %s4285_s7  ;;  %s2191_s12 = sshll.u32 %s182_s10, 10 }
  0x15   : > { %p34_p13 = scmp.eq.s32.totalorder %s33_s11, 0  ;;  %s2330_s18 = sshll.u32 %s3076_s16, 10 }
  0x16   : > { %s191_s25 = scalar_lea.hbm %s4270_s0, %s2330_s18  ;;  %s186_s26 = scalar_lea.vmem [#allocation2], %s2191_s12 }
  0x17   : > { %s3182_s21 = scalar_select %p34_p13, %s3068_s14, %s36_s8  }
  0x18   : > { %s194_s27 = sshll.u32 %s186_s26, 4  ;;  %s192_s28 = sshll.u32 %s191_s25, 4  ;;  %s195_s27 = int_to_ptr.vmem [resolvable:$true] %s194_s27  ;;  %s193_s28 = int_to_ptr.hbm [resolvable:$true] %s192_s28 }
  0x19   : > { %p2361_p0 = pnand %p2366_p11, %p3173_p12  ;;  %s183_s29 = scalar_lea.sflag [#allocation3], %s182_s10 }
  0x1a   : > { %206 = sbr.rel (%p3151_p5) target bundleno = 452 (0x1c4), region = 32  ;;  %s208_s5 = sand.u32 (!%p3151_p5), 1, %s3064_s13  }
  0x1b   : > { %2363 = dma.hbm_to_vmem [thread:$0]  (!%p2361_p0), %s193_s28, 16384, %s195_s27, %s183_s29, %s3083_s30, %s3083_s30, %s3084_s4  }
  0x1c   : > { %s2195_s6 = sshll.u32 (!%p3151_p5), %s208_s5, 10  ;;  %s209_s8 = scalar_lea.sflag (!%p3151_p5), [#allocation3], %s208_s5 }
  0x1d   : > { %s3197_s11 = scalar_lea.vmem (!%p3151_p5), [#allocation2], %s2195_s6 }
  0x1f   : > { %3051 = dma.done.wait (%p3144_p4), %s209_s8, 16384  }
  0x20   : > { %3053 = vsyncadd (%p3144_p4), %s209_s8, 4294950912 }
  0x21   : > { %3055 = dma.done.wait (%p3136_p1), [#allocation5], 528  }
  0x22   : > { %3057 = vsyncadd (%p3136_p1), [#allocation5], 4294966768  ;;  %v390_v0 = vld [vmem:[#allocation4 + $0x18] sm:$0xff]  ;;  %v389_v1 = vld [vmem:[#allocation4 + $0x10] sm:$0xff]  ;;  %vm395_vm0 = vcmask 261120   ;;  %s2198_s19 = sshll.u32 %s3072_s15, 7 }
  0x23   : > { %792 = vmatpush.msra.mxu0 %v390_v0  ;;  %2331 = vmatpush.msra.mxu1 %v390_v0  ;;  %v388_v2 = vld [vmem:[#allocation4 + $0x8] sm:$0xff]  ;;  %v387_v3 = vld [vmem:[#allocation4] sm:$0xff]  ;;  %v261_v12 = vld [vmem:[%s3197_s11 + $0x10] sm:$0xff]  ;;  %p3372_p1 = scmp.lt.s32.totalorder %s2198_s19, 255 }
  0x24   : > { %2332 = vmatpush.msra.mxu2 %v390_v0  ;;  %2333 = vmatpush.msra.mxu3 %v390_v0  ;;  %v259_v4 = vld [vmem:[%s3197_s11] sm:$0xff]  ;;  %v260_v8 = vld [vmem:[%s3197_s11 + $0x8] sm:$0xff]  ;;  %v293_v13 = vld [vmem:[%s3197_s11 + $0x110] sm:$0xff] }
  0x25   : > { %793 = vmatpush.msra.mxu0 %v389_v1  ;;  %2334 = vmatpush.msra.mxu1 %v389_v1  ;;  %v291_v5 = vld [vmem:[%s3197_s11 + $0x100] sm:$0xff]  ;;  %v292_v9 = vld [vmem:[%s3197_s11 + $0x108] sm:$0xff]  ;;  %v325_v14 = vld [vmem:[%s3197_s11 + $0x210] sm:$0xff]  ;;  %s4287_s19 = smov (!%p3372_p1, %s2198_s19), 255 }
  0x26   : > { %2335 = vmatpush.msra.mxu2 %v389_v1  ;;  %2336 = vmatpush.msra.mxu3 %v389_v1  ;;  %v323_v6 = vld [vmem:[%s3197_s11 + $0x200] sm:$0xff]  ;;  %v324_v10 = vld [vmem:[%s3197_s11 + $0x208] sm:$0xff]  ;;  %v357_v15 = vld [vmem:[%s3197_s11 + $0x310] sm:$0xff]  ;;  %s2199_s20 = sshll.u32 %s4287_s19, 3 }
  0x27   : > { %794 = vmatpush.msra.mxu0 %v388_v2  ;;  %2337 = vmatpush.msra.mxu1 %v388_v2  ;;  %v355_v7 = vld [vmem:[%s3197_s11 + $0x300] sm:$0xff]  ;;  %v356_v11 = vld [vmem:[%s3197_s11 + $0x308] sm:$0xff]  ;;  %v262_v16 = vld [vmem:[%s3197_s11 + $0x18] sm:$0xff]  ;;  %s3414_s4 = scalar_lea.vmem %s4273_s3, %s2199_s20 }
  0x28   : > { %2338 = vmatpush.msra.mxu2 %v388_v2  ;;  %2339 = vmatpush.msra.mxu3 %v388_v2  ;;  %v294_v17 = vld [vmem:[%s3197_s11 + $0x118] sm:$0xff]  ;;  %v263_v20 = vld [vmem:[%s3197_s11 + $0x20] sm:$0xff]  ;;  %v264_v24 = vld [vmem:[%s3197_s11 + $0x28] sm:$0xff] }
  0x29   : > { %795 = vmatpush.msra.mxu0 %v387_v3  ;;  %2340 = vmatpush.msra.mxu1 %v387_v3  ;;  %v326_v18 = vld [vmem:[%s3197_s11 + $0x218] sm:$0xff]  ;;  %v295_v21 = vld [vmem:[%s3197_s11 + $0x120] sm:$0xff]  ;;  %v296_v25 = vld [vmem:[%s3197_s11 + $0x128] sm:$0xff] }
  0x2a   : > { %2341 = vmatpush.msra.mxu2 %v387_v3  ;;  %2342 = vmatpush.msra.mxu3 %v387_v3  ;;  %v358_v19 = vld [vmem:[%s3197_s11 + $0x318] sm:$0xff]  ;;  %v327_v22 = vld [vmem:[%s3197_s11 + $0x220] sm:$0xff]  ;;  %v328_v26 = vld [vmem:[%s3197_s11 + $0x228] sm:$0xff] }
  0x2b   : > { %2200 = vmatmul.msk.f32.vlgmr.msra.gmra.mxu0 %vm395_vm0, %v259_v4  ;;  %2232 = vmatmul.msk.f32.vlgmr.msra.gmra.mxu1 %vm395_vm0, %v291_v5  ;;  %v359_v23 = vld [vmem:[%s3197_s11 + $0x320] sm:$0xff]  ;;  %v360_v27 = vld [vmem:[%s3197_s11 + $0x328] sm:$0xff]  ;;  %v265_v28 = vld [vmem:[%s3197_s11 + $0x30] sm:$0xff] }
  0x2c   : > { %2264 = vmatmul.msk.f32.vlgmr.msra.gmra.mxu2 %vm395_vm0, %v323_v6  ;;  %2296 = vmatmul.msk.f32.vlgmr.msra.gmra.mxu3 %vm395_vm0, %v355_v7  ;;  %v297_v29 = vld [vmem:[%s3197_s11 + $0x130] sm:$0xff]  ;;  %v266_v32 = vld [vmem:[%s3197_s11 + $0x38] sm:$0xff]  ;;  %v267_v36 = vld [vmem:[%s3197_s11 + $0x40] sm:$0xff] }
  0x2d   : > { %v329_v30 = vld [vmem:[%s3197_s11 + $0x230] sm:$0xff]  ;;  %v298_v33 = vld [vmem:[%s3197_s11 + $0x138] sm:$0xff]  ;;  %v299_v37 = vld [vmem:[%s3197_s11 + $0x140] sm:$0xff] }
  0x2e   : > { %v361_v31 = vld [vmem:[%s3197_s11 + $0x330] sm:$0xff]  ;;  %v330_v34 = vld [vmem:[%s3197_s11 + $0x238] sm:$0xff]  ;;  %v331_v38 = vld [vmem:[%s3197_s11 + $0x240] sm:$0xff] }
  0x2f   : > { %v362_v35 = vld [vmem:[%s3197_s11 + $0x338] sm:$0xff]  ;;  %v363_v39 = vld [vmem:[%s3197_s11 + $0x340] sm:$0xff]  ;;  %v268_v40 = vld [vmem:[%s3197_s11 + $0x48] sm:$0xff] }
  0x30   : > { %v300_v41 = vld [vmem:[%s3197_s11 + $0x148] sm:$0xff]  ;;  %v269_v44 = vld [vmem:[%s3197_s11 + $0x50] sm:$0xff]  ;;  %v270_v48 = vld [vmem:[%s3197_s11 + $0x58] sm:$0xff] }
  0x31   : > { %v332_v42 = vld [vmem:[%s3197_s11 + $0x248] sm:$0xff]  ;;  %v301_v45 = vld [vmem:[%s3197_s11 + $0x150] sm:$0xff]  ;;  %v302_v49 = vld [vmem:[%s3197_s11 + $0x158] sm:$0xff] }
  0x32   : > { %v364_v43 = vld [vmem:[%s3197_s11 + $0x348] sm:$0xff]  ;;  %v333_v46 = vld [vmem:[%s3197_s11 + $0x250] sm:$0xff]  ;;  %v334_v50 = vld [vmem:[%s3197_s11 + $0x258] sm:$0xff] }
  0x33   : > { %2201 = vmatmul.msk.f32.gmra.mxu0 %vm395_vm0, %v260_v8  ;;  %2233 = vmatmul.msk.f32.gmra.mxu1 %vm395_vm0, %v292_v9  ;;  %v365_v47 = vld [vmem:[%s3197_s11 + $0x350] sm:$0xff]  ;;  %v366_v51 = vld [vmem:[%s3197_s11 + $0x358] sm:$0xff]  ;;  %v271_v52 = vld [vmem:[%s3197_s11 + $0x60] sm:$0xff] }
  0x34   : > { %2265 = vmatmul.msk.f32.gmra.mxu2 %vm395_vm0, %v324_v10  ;;  %2297 = vmatmul.msk.f32.gmra.mxu3 %vm395_vm0, %v356_v11  ;;  %v303_v53 = vld [vmem:[%s3197_s11 + $0x160] sm:$0xff]  ;;  %v272_v56 = vld [vmem:[%s3197_s11 + $0x68] sm:$0xff]  ;;  %v273_v60 = vld [vmem:[%s3197_s11 + $0x70] sm:$0xff] }
  0x35   : > { %v335_v54 = vld [vmem:[%s3197_s11 + $0x260] sm:$0xff]  ;;  %v304_v57 = vld [vmem:[%s3197_s11 + $0x168] sm:$0xff]  ;;  %v305_v61 = vld [vmem:[%s3197_s11 + $0x170] sm:$0xff] }
  0x36   : > { %v367_v55 = vld [vmem:[%s3197_s11 + $0x360] sm:$0xff]  ;;  %v336_v58 = vld [vmem:[%s3197_s11 + $0x268] sm:$0xff]  ;;  %v337_v62 = vld [vmem:[%s3197_s11 + $0x270] sm:$0xff] }
  0x37   : > { %v368_v59 = vld [vmem:[%s3197_s11 + $0x368] sm:$0xff]  ;;  %v369_v63 = vld [vmem:[%s3197_s11 + $0x370] sm:$0xff]  ;;  %v274_v0 = vld [vmem:[%s3197_s11 + $0x78] sm:$0xff] }
  0x38   : > { %v306_v1 = vld [vmem:[%s3197_s11 + $0x178] sm:$0xff]  ;;  %v3335_v4 = vld [vmem:[#allocation6] ss:$0 sm:$0xff] }
  0x39   : > { %v338_v2 = vld [vmem:[%s3197_s11 + $0x278] sm:$0xff]  ;;  %v275_v7 = vld [vmem:[%s3197_s11 + $0x80] sm:$0xff] }
  0x3a   : > { %v370_v3 = vld [vmem:[%s3197_s11 + $0x378] sm:$0xff]  ;;  %v307_v8 = vld [vmem:[%s3197_s11 + $0x180] sm:$0xff] }
  0x3b   : > { %2202 = vmatmul.msk.f32.gmra.mxu0 %vm395_vm0, %v261_v12  ;;  %2234 = vmatmul.msk.f32.gmra.mxu1 %vm395_vm0, %v293_v13  ;;  %v339_v11 = vld [vmem:[%s3197_s11 + $0x280] sm:$0xff] }
  0x3c   : > { %2266 = vmatmul.msk.f32.gmra.mxu2 %vm395_vm0, %v325_v14  ;;  %2298 = vmatmul.msk.f32.gmra.mxu3 %vm395_vm0, %v357_v15  ;;  %v371_v12 = vld [vmem:[%s3197_s11 + $0x380] sm:$0xff] }
  0x43   : > { %2203 = vmatmul.msk.f32.gmra.mxu0 %vm395_vm0, %v262_v16  ;;  %2235 = vmatmul.msk.f32.gmra.mxu1 %vm395_vm0, %v294_v17 }
  0x44   : > { %2267 = vmatmul.msk.f32.gmra.mxu2 %vm395_vm0, %v326_v18  ;;  %2299 = vmatmul.msk.f32.gmra.mxu3 %vm395_vm0, %v358_v19 }
  0x4b   : > { %2204 = vmatmul.msk.f32.gmra.mxu0 %vm395_vm0, %v263_v20  ;;  %2236 = vmatmul.msk.f32.gmra.mxu1 %vm395_vm0, %v295_v21 }
  0x4c   : > { %2268 = vmatmul.msk.f32.gmra.mxu2 %vm395_vm0, %v327_v22  ;;  %2300 = vmatmul.msk.f32.gmra.mxu3 %vm395_vm0, %v359_v23  ;;  %v276_v23 = vld [vmem:[%s3197_s11 + $0x88] sm:$0xff] }
  0x53   : > { %2205 = vmatmul.msk.f32.gmra.mxu0 %vm395_vm0, %v264_v24  ;;  %2237 = vmatmul.msk.f32.gmra.mxu1 %vm395_vm0, %v296_v25  ;;  %v308_v24 = vld [vmem:[%s3197_s11 + $0x188] sm:$0xff] }
  0x54   : > { %2269 = vmatmul.msk.f32.gmra.mxu2 %vm395_vm0, %v328_v26  ;;  %2301 = vmatmul.msk.f32.gmra.mxu3 %vm395_vm0, %v360_v27  ;;  %v340_v27 = vld [vmem:[%s3197_s11 + $0x288] sm:$0xff] }
  0x5b   : > { %2206 = vmatmul.msk.f32.gmra.mxu0 %vm395_vm0, %v265_v28  ;;  %2238 = vmatmul.msk.f32.gmra.mxu1 %vm395_vm0, %v297_v29  ;;  %v372_v28 = vld [vmem:[%s3197_s11 + $0x388] sm:$0xff] }
  0x5c   : > { %2270 = vmatmul.msk.f32.gmra.mxu2 %vm395_vm0, %v329_v30  ;;  %2302 = vmatmul.msk.f32.gmra.mxu3 %vm395_vm0, %v361_v31 }
  0x63   : > { %2207 = vmatmul.msk.f32.gmra.mxu0 %vm395_vm0, %v266_v32  ;;  %2239 = vmatmul.msk.f32.gmra.mxu1 %vm395_vm0, %v298_v33 }
  0x64   : > { %2271 = vmatmul.msk.f32.gmra.mxu2 %vm395_vm0, %v330_v34  ;;  %2303 = vmatmul.msk.f32.gmra.mxu3 %vm395_vm0, %v362_v35 }
  0x6b   : > { %2208 = vmatmul.msk.f32.gmra.mxu0 %vm395_vm0, %v267_v36  ;;  %2240 = vmatmul.msk.f32.gmra.mxu1 %vm395_vm0, %v299_v37 }
  0x6c   : > { %2272 = vmatmul.msk.f32.gmra.mxu2 %vm395_vm0, %v331_v38  ;;  %2304 = vmatmul.msk.f32.gmra.mxu3 %vm395_vm0, %v363_v39 }
  0x73   : > { %2209 = vmatmul.msk.f32.gmra.mxu0 %vm395_vm0, %v268_v40  ;;  %2241 = vmatmul.msk.f32.gmra.mxu1 %vm395_vm0, %v300_v41 }
  0x74   : > { %2273 = vmatmul.msk.f32.gmra.mxu2 %vm395_vm0, %v332_v42  ;;  %2305 = vmatmul.msk.f32.gmra.mxu3 %vm395_vm0, %v364_v43 }
  0x7b   : > { %2210 = vmatmul.msk.f32.gmra.mxu0 %vm395_vm0, %v269_v44  ;;  %2242 = vmatmul.msk.f32.gmra.mxu1 %vm395_vm0, %v301_v45 }
  0x7c   : > { %2274 = vmatmul.msk.f32.gmra.mxu2 %vm395_vm0, %v333_v46  ;;  %2306 = vmatmul.msk.f32.gmra.mxu3 %vm395_vm0, %v365_v47  ;;  %v277_v47 = vld [vmem:[%s3197_s11 + $0x90] sm:$0xff] }
  0x83   : > { %2211 = vmatmul.msk.f32.gmra.mxu0 %vm395_vm0, %v270_v48  ;;  %2243 = vmatmul.msk.f32.gmra.mxu1 %vm395_vm0, %v302_v49  ;;  %v309_v48 = vld [vmem:[%s3197_s11 + $0x190] sm:$0xff] }
  0x84   : > { %2275 = vmatmul.msk.f32.gmra.mxu2 %vm395_vm0, %v334_v50  ;;  %2307 = vmatmul.msk.f32.gmra.mxu3 %vm395_vm0, %v366_v51  ;;  %v341_v51 = vld [vmem:[%s3197_s11 + $0x290] sm:$0xff] }
  0x8b   : > { %2212 = vmatmul.msk.f32.gmra.mxu0 %vm395_vm0, %v271_v52  ;;  %2244 = vmatmul.msk.f32.gmra.mxu1 %vm395_vm0, %v303_v53  ;;  %v373_v52 = vld [vmem:[%s3197_s11 + $0x390] sm:$0xff] }
  0x8c   : > { %2276 = vmatmul.msk.f32.gmra.mxu2 %vm395_vm0, %v335_v54  ;;  %2308 = vmatmul.msk.f32.gmra.mxu3 %vm395_vm0, %v367_v55 }
  0x93   : > { %2213 = vmatmul.msk.f32.gmra.mxu0 %vm395_vm0, %v272_v56  ;;  %2245 = vmatmul.msk.f32.gmra.mxu1 %vm395_vm0, %v304_v57 }
  0x94   : > { %2277 = vmatmul.msk.f32.gmra.mxu2 %vm395_vm0, %v336_v58  ;;  %2309 = vmatmul.msk.f32.gmra.mxu3 %vm395_vm0, %v368_v59 }
  0x9b   : > { %2214 = vmatmul.msk.f32.gmra.mxu0 %vm395_vm0, %v273_v60  ;;  %2246 = vmatmul.msk.f32.gmra.mxu1 %vm395_vm0, %v305_v61 }
  0x9c   : > { %2278 = vmatmul.msk.f32.gmra.mxu2 %vm395_vm0, %v337_v62  ;;  %2310 = vmatmul.msk.f32.gmra.mxu3 %vm395_vm0, %v369_v63 }
  0xa3   : > { %2215 = vmatmul.msk.f32.gmra.mxu0 %vm395_vm0, %v274_v0  ;;  %2247 = vmatmul.msk.f32.gmra.mxu1 %vm395_vm0, %v306_v1 }
  0xa4   : > { %2279 = vmatmul.msk.f32.gmra.mxu2 %vm395_vm0, %v338_v2  ;;  %2311 = vmatmul.msk.f32.gmra.mxu3 %vm395_vm0, %v370_v3 }
  0xa8   : > { %v797_v5 = vpop.f32.mrf.mxu0  ;;  %v893_v6 = vpop.f32.mrf.mxu1 }
  0xa9   : > { %v3340_v9 = vadd.f32 %v3335_v4, %v797_v5  ;;  %v3343_v10 = vadd.f32 %v3335_v4, %v893_v6 }
  0xab   : > { %v1181_v13 = vsub.f32 0.0, %v3340_v9  ;;  %v1213_v14 = vsub.f32 0.0, %v3343_v10  ;;  %2216 = vmatmul.msk.f32.gmra.mxu0 %vm395_vm0, %v275_v7  ;;  %2248 = vmatmul.msk.f32.gmra.mxu1 %vm395_vm0, %v307_v8 }
  0xac   : > { %2280 = vmatmul.msk.f32.gmra.mxu2 %vm395_vm0, %v339_v11  ;;  %2312 = vmatmul.msk.f32.gmra.mxu3 %vm395_vm0, %v371_v12 }
  0xad   : > { %v1309_v15 = vmul.f32 1.442695, %v1181_v13  ;;  %v1373_v16 = vmul.f32 1.442695, %v1213_v14 }
  0xaf   : > { %2422 = vpow2.f32 %v1309_v15  ;;  %v989_v17 = vpop.f32.mrf.mxu2  ;;  %v1085_v18 = vpop.f32.mrf.mxu3  ;;  %v310_v15 = vld [vmem:[%s3197_s11 + $0x198] sm:$0xff] }
  0xb0   : > { %2424 = vpow2.f32 %v1373_v16  ;;  %v3355_v19 = vadd.f32 %v3335_v4, %v989_v17  ;;  %v3358_v20 = vadd.f32 %v3335_v4, %v1085_v18  ;;  %v800_v21 = vpop.f32.mrf.mxu0  ;;  %v896_v22 = vpop.f32.mrf.mxu1 }
  0xb1   : > { %v3363_v25 = vadd.f32 %v3335_v4, %v800_v21  ;;  %v3366_v26 = vadd.f32 %v3335_v4, %v896_v22  ;;  %v342_v21 = vld [vmem:[%s3197_s11 + $0x298] sm:$0xff] }
  0xb2   : > { %v1245_v29 = vsub.f32 0.0, %v3355_v19  ;;  %v1277_v30 = vsub.f32 0.0, %v3358_v20  ;;  %v374_v22 = vld [vmem:[%s3197_s11 + $0x398] sm:$0xff] }
  0xb3   : > { %v1182_v31 = vsub.f32 0.0, %v3363_v25  ;;  %v1214_v32 = vsub.f32 0.0, %v3366_v26  ;;  %2217 = vmatmul.msk.f32.gmra.mxu0 %vm395_vm0, %v276_v23  ;;  %2249 = vmatmul.msk.f32.gmra.mxu1 %vm395_vm0, %v308_v24 }
  0xb4   : > { %v1437_v33 = vmul.f32 1.442695, %v1245_v29  ;;  %v1501_v34 = vmul.f32 1.442695, %v1277_v30  ;;  %2281 = vmatmul.msk.f32.gmra.mxu2 %vm395_vm0, %v340_v27  ;;  %2313 = vmatmul.msk.f32.gmra.mxu3 %vm395_vm0, %v372_v28 }
  0xb5   : > { %v2423_v35 = vpop.eup %2422  ;;  %v1311_v38 = vmul.f32 1.442695, %v1182_v31  ;;  %v1375_v40 = vmul.f32 1.442695, %v1214_v32 }
  0xb6   : > { %v2425_v36 = vpop.eup %2424  ;;  %v1565_v37 = vadd.f32 1.0, %v2423_v35  ;;  %2426 = vpow2.f32 %v1437_v33 }
  0xb7   : > { %v1597_v39 = vadd.f32 1.0, %v2425_v36  ;;  %2428 = vpow2.f32 %v1501_v34  ;;  %v992_v41 = vpop.f32.mrf.mxu2  ;;  %v1088_v42 = vpop.f32.mrf.mxu3 }
  0xb8   : > { %2430 = vrcp.f32 %v1565_v37  ;;  %v3387_v43 = vadd.f32 %v3335_v4, %v992_v41  ;;  %v3390_v44 = vadd.f32 %v3335_v4, %v1088_v42  ;;  %v803_v45 = vpop.f32.mrf.mxu0  ;;  %v899_v46 = vpop.f32.mrf.mxu1 }
  0xb9   : > { %2432 = vrcp.f32 %v1597_v39  ;;  %v3395_v49 = vadd.f32 %v3335_v4, %v803_v45  ;;  %v3398_v50 = vadd.f32 %v3335_v4, %v899_v46 }
  0xba   : > { %2434 = vpow2.f32 %v1311_v38  ;;  %v1246_v53 = vsub.f32 0.0, %v3387_v43  ;;  %v1278_v54 = vsub.f32 0.0, %v3390_v44 }
  0xbb   : > { %2436 = vpow2.f32 %v1375_v40  ;;  %v1183_v55 = vsub.f32 0.0, %v3395_v49  ;;  %v1215_v56 = vsub.f32 0.0, %v3398_v50  ;;  %2218 = vmatmul.msk.f32.gmra.mxu0 %vm395_vm0, %v277_v47  ;;  %2250 = vmatmul.msk.f32.gmra.mxu1 %vm395_vm0, %v309_v48 }
  0xbc   : > { %v2427_v57 = vpop.eup %2426  ;;  %v1439_v58 = vmul.f32 1.442695, %v1246_v53  ;;  %2282 = vmatmul.msk.f32.gmra.mxu2 %vm395_vm0, %v341_v51  ;;  %2314 = vmatmul.msk.f32.gmra.mxu3 %vm395_vm0, %v373_v52  ;;  %v1503_v61 = vmul.f32 1.442695, %v1278_v54  ;;  %v311_v52 = vld [vmem:[%s3197_s11 + $0x1a0] sm:$0xff] }
  0xbd   : > { %v2429_v59 = vpop.eup %2428  ;;  %v1629_v60 = vadd.f32 1.0, %v2427_v57  ;;  %v1313_v0 = vmul.f32 1.442695, %v1183_v55  ;;  %v1377_v3 = vmul.f32 1.442695, %v1215_v56  ;;  %v343_v57 = vld [vmem:[%s3197_s11 + $0x2a0] sm:$0xff] }
  0xbe   : > { %v2431_v62 = vpop.eup %2430  ;;  %v1661_v63 = vadd.f32 1.0, %v2429_v59  ;;  %2438 = vpow2.f32 %v1439_v58  ;;  %v375_v58 = vld [vmem:[%s3197_s11 + $0x3a0] sm:$0xff] }
  0xbf   : > { %v2433_v1 = vpop.eup %2432  ;;  %v1821_v2 = vmul.f32 %v2431_v62, %v3340_v9  ;;  %2440 = vrcp.f32 %v1629_v60  ;;  %v995_v5 = vpop.f32.mrf.mxu2  ;;  %v278_v9 = vld [vmem:[%s3197_s11 + $0x98] sm:$0xff] }
  0xc0   : > { %v1091_v6 = vpop.f32.mrf.mxu3  ;;  %v2435_v7 = vpop.eup %2434  ;;  %v1853_v8 = vmul.f32 %v2433_v1, %v3343_v10  ;;  %2442 = vrcp.f32 %v1661_v63  ;;  %v3419_v11 = vadd.f32 %v3335_v4, %v995_v5 }
  0xc1   : > { %v3422_v12 = vadd.f32 %v3335_v4, %v1091_v6  ;;  %v806_v13 = vpop.f32.mrf.mxu0  ;;  %v902_v14 = vpop.f32.mrf.mxu1  ;;  %1949 = vst [vmem:[%s3414_s4] sm:$0xff] %v1821_v2  ;;  %v1566_v17 = vadd.f32 1.0, %v2435_v7  ;;  %2444 = vpow2.f32 %v1503_v61 }
  0xc2   : > { %v2437_v16 = vpop.eup %2436  ;;  %v3428_v18 = vadd.f32 %v3335_v4, %v806_v13  ;;  %v3431_v10 = vadd.f32 %v3335_v4, %v902_v14  ;;  %1981 = vst [vmem:[%s3414_s4 + $0x100] sm:$0xff] %v1853_v8  ;;  %2446 = vpow2.f32 %v1313_v0  ;;  %v1247_v24 = vsub.f32 0.0, %v3419_v11 }
  0xc3   : > { %v1598_v23 = vadd.f32 1.0, %v2437_v16  ;;  %v1279_v27 = vsub.f32 0.0, %v3422_v12  ;;  %2448 = vrcp.f32 %v1566_v17  ;;  %2219 = vmatmul.msk.f32.gmra.mxu0 %vm395_vm0, %v278_v9  ;;  %2251 = vmatmul.msk.f32.gmra.mxu1 %vm395_vm0, %v310_v15 }
  0xc4   : > { %v1184_v28 = vsub.f32 0.0, %v3428_v18  ;;  %v1216_v29 = vsub.f32 0.0, %v3431_v10  ;;  %v2439_v30 = vpop.eup %2438  ;;  %v1441_v31 = vmul.f32 1.442695, %v1247_v24  ;;  %2283 = vmatmul.msk.f32.gmra.mxu2 %vm395_vm0, %v342_v21  ;;  %2315 = vmatmul.msk.f32.gmra.mxu3 %vm395_vm0, %v374_v22 }
  0xc5   : > { %2450 = vrcp.f32 %v1598_v23  ;;  %v1505_v32 = vmul.f32 1.442695, %v1279_v27  ;;  %v2441_v33 = vpop.eup %2440  ;;  %v1630_v34 = vadd.f32 1.0, %v2439_v30  ;;  %v312_v30 = vld [vmem:[%s3197_s11 + $0x1a8] sm:$0xff] }
  0xc6   : > { %2452 = vpow2.f32 %v1377_v3  ;;  %v1315_v35 = vmul.f32 1.442695, %v1184_v28  ;;  %v2443_v36 = vpop.eup %2442  ;;  %v1885_v37 = vmul.f32 %v2441_v33, %v3355_v19  ;;  %v1379_v40 = vmul.f32 1.442695, %v1216_v29  ;;  %v280_v29 = vld [vmem:[%s3197_s11 + $0xa8] sm:$0xff] }
  0xc7   : > { %2454 = vpow2.f32 %v1441_v31  ;;  %v2445_v38 = vpop.eup %2444  ;;  %v1917_v39 = vmul.f32 %v2443_v36, %v3358_v20  ;;  %v998_v41 = vpop.f32.mrf.mxu2  ;;  %v279_v20 = vld [vmem:[%s3197_s11 + $0xa0] sm:$0xff]  ;;  %v376_v36 = vld [vmem:[%s3197_s11 + $0x3a8] sm:$0xff] }
  0xc8   : > { %2456 = vrcp.f32 %v1630_v34  ;;  %v1094_v42 = vpop.f32.mrf.mxu3  ;;  %v2447_v45 = vpop.eup %2446  ;;  %2013 = vst [vmem:[%s3414_s4 + $0x200] sm:$0xff] %v1885_v37  ;;  %v1662_v46 = vadd.f32 1.0, %v2445_v38  ;;  %v3448_v47 = vadd.f32 %v3335_v4, %v998_v41 }
  0xc9   : > { %2458 = vpow2.f32 %v1505_v32  ;;  %v3451_v19 = vadd.f32 %v3335_v4, %v1094_v42  ;;  %v809_v48 = vpop.f32.mrf.mxu0  ;;  %v905_v51 = vpop.f32.mrf.mxu1  ;;  %2045 = vst [vmem:[%s3414_s4 + $0x300] sm:$0xff] %v1917_v39  ;;  %v1567_v54 = vadd.f32 1.0, %v2447_v45 }
  0xca   : > { %v2449_v53 = vpop.eup %2448  ;;  %2460 = vpow2.f32 %v1315_v35  ;;  %v3457_v55 = vadd.f32 %v3335_v4, %v809_v48  ;;  %v3460_v56 = vadd.f32 %v3335_v4, %v905_v51  ;;  %v1248_v61 = vsub.f32 0.0, %v3448_v47  ;;  %v344_v35 = vld [vmem:[%s3197_s11 + $0x2a8] sm:$0xff] }
  0xcb   : > { %v2451_v59 = vpop.eup %2450  ;;  %v1822_v60 = vmul.f32 %v2449_v53, %v3363_v25  ;;  %2462 = vrcp.f32 %v1662_v46  ;;  %v1280_v62 = vsub.f32 0.0, %v3451_v19  ;;  %2220 = vmatmul.msk.f32.gmra.mxu0 %vm395_vm0, %v279_v20  ;;  %2252 = vmatmul.msk.f32.gmra.mxu1 %vm395_vm0, %v311_v52 }
  0xcc   : > { %v2453_v63 = vpop.eup %2452  ;;  %v1854_v0 = vmul.f32 %v2451_v59, %v3366_v26  ;;  %2464 = vrcp.f32 %v1567_v54  ;;  %v1185_v1 = vsub.f32 0.0, %v3457_v55  ;;  %v1217_v2 = vsub.f32 0.0, %v3460_v56  ;;  %2284 = vmatmul.msk.f32.gmra.mxu2 %vm395_vm0, %v343_v57  ;;  %2316 = vmatmul.msk.f32.gmra.mxu3 %vm395_vm0, %v375_v58 }
  0xcd   : > { %v2455_v3 = vpop.eup %2454  ;;  %1950 = vst [vmem:[%s3414_s4 + $0x8] sm:$0xff] %v1822_v60  ;;  %v1599_v25 = vadd.f32 1.0, %v2453_v63  ;;  %2466 = vpow2.f32 %v1379_v40  ;;  %v1443_v5 = vmul.f32 1.442695, %v1248_v61  ;;  %v1507_v13 = vmul.f32 1.442695, %v1280_v62 }
  0xce   : > { %v2457_v26 = vpop.eup %2456  ;;  %1982 = vst [vmem:[%s3414_s4 + $0x108] sm:$0xff] %v1854_v0  ;;  %v1631_v6 = vadd.f32 1.0, %v2455_v3  ;;  %v1317_v15 = vmul.f32 1.442695, %v1185_v1  ;;  %v1381_v16 = vmul.f32 1.442695, %v1217_v2 }
  0xcf   : > { %v2459_v7 = vpop.eup %2458  ;;  %v1886_v8 = vmul.f32 %v2457_v26, %v3387_v43  ;;  %2468 = vrcp.f32 %v1599_v25  ;;  %v1001_v17 = vpop.f32.mrf.mxu2  ;;  %v281_v1 = vld [vmem:[%s3197_s11 + $0xb0] sm:$0xff] }
  0xd0   : > { %v2461_v14 = vpop.eup %2460  ;;  %2470 = vrcp.f32 %v1631_v6  ;;  %v1663_v9 = vadd.f32 1.0, %v2459_v7  ;;  %v1097_v21 = vpop.f32.mrf.mxu3  ;;  %v3479_v24 = vadd.f32 %v3335_v4, %v1001_v17  ;;  %v313_v2 = vld [vmem:[%s3197_s11 + $0x1b0] sm:$0xff] }
  0xd1   : > { %v2463_v22 = vpop.eup %2462  ;;  %2014 = vst [vmem:[%s3414_s4 + $0x208] sm:$0xff] %v1886_v8  ;;  %v1568_v23 = vadd.f32 1.0, %v2461_v14  ;;  %2472 = vpow2.f32 %v1443_v5  ;;  %v3482_v43 = vadd.f32 %v3335_v4, %v1097_v21  ;;  %v812_v27 = vpop.f32.mrf.mxu0  ;;  %v345_v26 = vld [vmem:[%s3197_s11 + $0x2b0] sm:$0xff] }
  0xd2   : > { %v908_v28 = vpop.f32.mrf.mxu1  ;;  %v2465_v31 = vpop.eup %2464  ;;  %v1918_v32 = vmul.f32 %v2463_v22, %v3390_v44  ;;  %2474 = vrcp.f32 %v1663_v9  ;;  %v3488_v33 = vadd.f32 %v3335_v4, %v812_v27  ;;  %v1249_v39 = vsub.f32 0.0, %v3479_v24  ;;  %v377_v6 = vld [vmem:[%s3197_s11 + $0x3b0] sm:$0xff] }
  0xd3   : > { %v3491_v34 = vadd.f32 %v3335_v4, %v908_v28  ;;  %v2467_v37 = vpop.eup %2466  ;;  %v1823_v38 = vmul.f32 %v2465_v31, %v3395_v49  ;;  %2476 = vrcp.f32 %v1568_v23  ;;  %v1281_v40 = vsub.f32 0.0, %v3482_v43  ;;  %2221 = vmatmul.msk.f32.gmra.mxu0 %vm395_vm0, %v280_v29  ;;  %2253 = vmatmul.msk.f32.gmra.mxu1 %vm395_vm0, %v312_v30 }
  0xd4   : > { %2046 = vst [vmem:[%s3414_s4 + $0x308] sm:$0xff] %v1918_v32  ;;  %v1600_v44 = vadd.f32 1.0, %v2467_v37  ;;  %2478 = vpow2.f32 %v1507_v13  ;;  %v1186_v41 = vsub.f32 0.0, %v3488_v33  ;;  %v1445_v49 = vmul.f32 1.442695, %v1249_v39  ;;  %2285 = vmatmul.msk.f32.gmra.mxu2 %vm395_vm0, %v344_v35  ;;  %2317 = vmatmul.msk.f32.gmra.mxu3 %vm395_vm0, %v376_v36 }
  0xd5   : > { %v1218_v42 = vsub.f32 0.0, %v3491_v34  ;;  %v2469_v45 = vpop.eup %2468  ;;  %1951 = vst [vmem:[%s3414_s4 + $0x10] sm:$0xff] %v1823_v38  ;;  %2480 = vpow2.f32 %v1317_v15  ;;  %v1509_v46 = vmul.f32 1.442695, %v1281_v40 }
  0xd6   : > { %v2471_v48 = vpop.eup %2470  ;;  %v1855_v51 = vmul.f32 %v2469_v45, %v3398_v50  ;;  %2482 = vrcp.f32 %v1600_v44  ;;  %v1319_v53 = vmul.f32 1.442695, %v1186_v41  ;;  %v282_v45 = vld [vmem:[%s3197_s11 + $0xb8] sm:$0xff] }
  0xd7   : > { %v2473_v20 = vpop.eup %2472  ;;  %v1887_v52 = vmul.f32 %v2471_v48, %v3419_v11  ;;  %2484 = vpow2.f32 %v1381_v16  ;;  %v1383_v58 = vmul.f32 1.442695, %v1218_v42  ;;  %v1004_v59 = vpop.f32.mrf.mxu2 }
  0xd8   : > { %v2475_v54 = vpop.eup %2474  ;;  %1983 = vst [vmem:[%s3414_s4 + $0x110] sm:$0xff] %v1855_v51  ;;  %v1632_v57 = vadd.f32 1.0, %v2473_v20  ;;  %2486 = vpow2.f32 %v1445_v49  ;;  %v1100_v60 = vpop.f32.mrf.mxu3  ;;  %v3512_v11 = vadd.f32 %v3335_v4, %v1004_v59  ;;  %v314_v49 = vld [vmem:[%s3197_s11 + $0x1b8] sm:$0xff] }
  0xd9   : > { %v2477_v61 = vpop.eup %2476  ;;  %2015 = vst [vmem:[%s3414_s4 + $0x210] sm:$0xff] %v1887_v52  ;;  %v1919_v50 = vmul.f32 %v2475_v54, %v3422_v12  ;;  %2488 = vpow2.f32 %v1509_v46  ;;  %v3515_v62 = vadd.f32 %v3335_v4, %v1100_v60  ;;  %v815_v63 = vpop.f32.mrf.mxu0  ;;  %v346_v20 = vld [vmem:[%s3197_s11 + $0x2b8] sm:$0xff] }
  0xda   : > { %v911_v0 = vpop.f32.mrf.mxu1  ;;  %v2479_v3 = vpop.eup %2478  ;;  %v1824_v25 = vmul.f32 %v2477_v61, %v3428_v18  ;;  %2490 = vrcp.f32 %v1632_v57  ;;  %v3521_v5 = vadd.f32 %v3335_v4, %v815_v63  ;;  %v1250_v13 = vsub.f32 0.0, %v3512_v11  ;;  %v378_v52 = vld [vmem:[%s3197_s11 + $0x3b8] sm:$0xff] }
  0xdb   : > { %v3524_v12 = vadd.f32 %v3335_v4, %v911_v0  ;;  %v2481_v7 = vpop.eup %2480  ;;  %2047 = vst [vmem:[%s3414_s4 + $0x310] sm:$0xff] %v1919_v50  ;;  %v1664_v8 = vadd.f32 1.0, %v2479_v3  ;;  %2492 = vpow2.f32 %v1319_v53  ;;  %v1282_v14 = vsub.f32 0.0, %v3515_v62  ;;  %2222 = vmatmul.msk.f32.gmra.mxu0 %vm395_vm0, %v281_v1  ;;  %2254 = vmatmul.msk.f32.gmra.mxu1 %vm395_vm0, %v313_v2 }
  0xdc   : > { %v2483_v9 = vpop.eup %2482  ;;  %1952 = vst [vmem:[%s3414_s4 + $0x18] sm:$0xff] %v1824_v25  ;;  %v1569_v18 = vadd.f32 1.0, %v2481_v7  ;;  %2494 = vpow2.f32 %v1383_v58  ;;  %v1187_v15 = vsub.f32 0.0, %v3521_v5  ;;  %v1447_v22 = vmul.f32 1.442695, %v1250_v13  ;;  %2286 = vmatmul.msk.f32.gmra.mxu2 %vm395_vm0, %v345_v26  ;;  %2318 = vmatmul.msk.f32.gmra.mxu3 %vm395_vm0, %v377_v6 }
  0xdd   : > { %v1219_v16 = vsub.f32 0.0, %v3524_v12  ;;  %v2485_v17 = vpop.eup %2484  ;;  %v1856_v21 = vmul.f32 %v2483_v9, %v3431_v10  ;;  %2496 = vrcp.f32 %v1664_v8  ;;  %v1511_v30 = vmul.f32 1.442695, %v1282_v14 }
  0xde   : > { %v2487_v23 = vpop.eup %2486  ;;  %2498 = vrcp.f32 %v1569_v18  ;;  %v1601_v27 = vadd.f32 1.0, %v2485_v17  ;;  %v1321_v10 = vmul.f32 1.442695, %v1187_v15  ;;  %v283_v17 = vld [vmem:[%s3197_s11 + $0xc0] sm:$0xff] }
  0xdf   : > { %v2489_v28 = vpop.eup %2488  ;;  %1984 = vst [vmem:[%s3414_s4 + $0x118] sm:$0xff] %v1856_v21  ;;  %v1633_v29 = vadd.f32 1.0, %v2487_v23  ;;  %2500 = vpow2.f32 %v1447_v22  ;;  %v1385_v35 = vmul.f32 1.442695, %v1219_v16  ;;  %v1007_v36 = vpop.f32.mrf.mxu2  ;;  %v315_v21 = vld [vmem:[%s3197_s11 + $0x1c0] sm:$0xff] }
  0xe0   : > { %v2491_v31 = vpop.eup %2490  ;;  %2502 = vrcp.f32 %v1601_v27  ;;  %v1665_v32 = vadd.f32 1.0, %v2489_v28  ;;  %v1103_v37 = vpop.f32.mrf.mxu3  ;;  %v3542_v40 = vadd.f32 %v3335_v4, %v1007_v36  ;;  %v347_v28 = vld [vmem:[%s3197_s11 + $0x2c0] sm:$0xff] }
  0xe1   : > { %v2493_v38 = vpop.eup %2492  ;;  %v1888_v39 = vmul.f32 %v2491_v31, %v3448_v47  ;;  %2504 = vrcp.f32 %v1633_v29  ;;  %v3545_v44 = vadd.f32 %v3335_v4, %v1103_v37  ;;  %v818_v41 = vpop.f32.mrf.mxu0  ;;  %v379_v29 = vld [vmem:[%s3197_s11 + $0x3c0] sm:$0xff] }
  0xe2   : > { %v914_v42 = vpop.f32.mrf.mxu1  ;;  %v2495_v46 = vpop.eup %2494  ;;  %2506 = vrcp.f32 %v1665_v32  ;;  %v1570_v48 = vadd.f32 1.0, %v2493_v38  ;;  %v3550_v51 = vadd.f32 %v3335_v4, %v818_v41  ;;  %v1251_v57 = vsub.f32 0.0, %v3542_v40 }
  0xe3   : > { %v3553_v47 = vadd.f32 %v3335_v4, %v914_v42  ;;  %v2497_v53 = vpop.eup %2496  ;;  %2016 = vst [vmem:[%s3414_s4 + $0x218] sm:$0xff] %v1888_v39  ;;  %v1602_v54 = vadd.f32 1.0, %v2495_v46  ;;  %2508 = vpow2.f32 %v1511_v30  ;;  %v1283_v58 = vsub.f32 0.0, %v3545_v44  ;;  %2223 = vmatmul.msk.f32.gmra.mxu0 %vm395_vm0, %v282_v45  ;;  %2255 = vmatmul.msk.f32.gmra.mxu1 %vm395_vm0, %v314_v49 }
  0xe4   : > { %v2499_v59 = vpop.eup %2498  ;;  %v1920_v60 = vmul.f32 %v2497_v53, %v3451_v19  ;;  %2510 = vrcp.f32 %v1570_v48  ;;  %v1188_v61 = vsub.f32 0.0, %v3550_v51  ;;  %v1449_v1 = vmul.f32 1.442695, %v1251_v57  ;;  %2287 = vmatmul.msk.f32.gmra.mxu2 %vm395_vm0, %v346_v20  ;;  %2319 = vmatmul.msk.f32.gmra.mxu3 %vm395_vm0, %v378_v52 }
  0xe5   : > { %v1220_v50 = vsub.f32 0.0, %v3553_v47  ;;  %v2501_v63 = vpop.eup %2500  ;;  %v1825_v0 = vmul.f32 %v2499_v59, %v3457_v55  ;;  %2512 = vrcp.f32 %v1602_v54  ;;  %v1513_v3 = vmul.f32 1.442695, %v1283_v58 }
  0xe6   : > { %v2503_v19 = vpop.eup %2502  ;;  %2048 = vst [vmem:[%s3414_s4 + $0x318] sm:$0xff] %v1920_v60  ;;  %v1634_v2 = vadd.f32 1.0, %v2501_v63  ;;  %2514 = vpow2.f32 %v1321_v10  ;;  %v1323_v6 = vmul.f32 1.442695, %v1188_v61  ;;  %v284_v63 = vld [vmem:[%s3197_s11 + $0xc8] sm:$0xff] }
  0xe7   : > { %v2505_v25 = vpop.eup %2504  ;;  %1953 = vst [vmem:[%s3414_s4 + $0x20] sm:$0xff] %v1825_v0  ;;  %v1857_v26 = vmul.f32 %v2503_v19, %v3460_v56  ;;  %2516 = vpow2.f32 %v1385_v35  ;;  %v1387_v8 = vmul.f32 1.442695, %v1220_v50  ;;  %v1010_v13 = vpop.f32.mrf.mxu2  ;;  %v316_v0 = vld [vmem:[%s3197_s11 + $0x1c8] sm:$0xff] }
  0xe8   : > { %v2507_v55 = vpop.eup %2506  ;;  %v1889_v7 = vmul.f32 %v2505_v25, %v3479_v24  ;;  %2518 = vrcp.f32 %v1634_v2  ;;  %v1106_v14 = vpop.f32.mrf.mxu3  ;;  %v3575_v56 = vadd.f32 %v3335_v4, %v1010_v13  ;;  %v348_v25 = vld [vmem:[%s3197_s11 + $0x2c8] sm:$0xff] }
  0xe9   : > { %v2509_v9 = vpop.eup %2508  ;;  %1985 = vst [vmem:[%s3414_s4 + $0x120] sm:$0xff] %v1857_v26  ;;  %v1921_v18 = vmul.f32 %v2507_v55, %v3482_v43  ;;  %2520 = vpow2.f32 %v1449_v1  ;;  %v3578_v15 = vadd.f32 %v3335_v4, %v1106_v14  ;;  %v821_v24 = vpop.f32.mrf.mxu0  ;;  %v380_v26 = vld [vmem:[%s3197_s11 + $0x3c8] sm:$0xff] }
  0xea   : > { %v917_v16 = vpop.f32.mrf.mxu1  ;;  %v2511_v22 = vpop.eup %2510  ;;  %2017 = vst [vmem:[%s3414_s4 + $0x220] sm:$0xff] %v1889_v7  ;;  %v1666_v23 = vadd.f32 1.0, %v2509_v9  ;;  %2522 = vpow2.f32 %v1513_v3  ;;  %v3584_v27 = vadd.f32 %v3335_v4, %v821_v24  ;;  %v1252_v32 = vsub.f32 0.0, %v3575_v56 }
  0xeb   : > { %v3587_v43 = vadd.f32 %v3335_v4, %v917_v16  ;;  %v2513_v30 = vpop.eup %2512  ;;  %2049 = vst [vmem:[%s3414_s4 + $0x320] sm:$0xff] %v1921_v18  ;;  %v1826_v31 = vmul.f32 %v2511_v22, %v3488_v33  ;;  %2524 = vpow2.f32 %v1323_v6  ;;  %v1284_v10 = vsub.f32 0.0, %v3578_v15  ;;  %2224 = vmatmul.msk.f32.gmra.mxu0 %vm395_vm0, %v283_v17  ;;  %2256 = vmatmul.msk.f32.gmra.mxu1 %vm395_vm0, %v315_v21 }
  0xec   : > { %v2515_v35 = vpop.eup %2514  ;;  %v1858_v36 = vmul.f32 %v2513_v30, %v3491_v34  ;;  %2526 = vrcp.f32 %v1666_v23  ;;  %v1189_v37 = vsub.f32 0.0, %v3584_v27  ;;  %v1451_v41 = vmul.f32 1.442695, %v1252_v32  ;;  %2288 = vmatmul.msk.f32.gmra.mxu2 %vm395_vm0, %v347_v28  ;;  %2320 = vmatmul.msk.f32.gmra.mxu3 %vm395_vm0, %v379_v29 }
  0xed   : > { %v1221_v38 = vsub.f32 0.0, %v3587_v43  ;;  %v2517_v39 = vpop.eup %2516  ;;  %1954 = vst [vmem:[%s3414_s4 + $0x28] sm:$0xff] %v1826_v31  ;;  %v1571_v33 = vadd.f32 1.0, %v2515_v35  ;;  %2528 = vpow2.f32 %v1387_v8  ;;  %v1515_v46 = vmul.f32 1.442695, %v1284_v10 }
  0xee   : > { %v2519_v34 = vpop.eup %2518  ;;  %1986 = vst [vmem:[%s3414_s4 + $0x128] sm:$0xff] %v1858_v36  ;;  %v1603_v42 = vadd.f32 1.0, %v2517_v39  ;;  %v1325_v52 = vmul.f32 1.442695, %v1189_v37  ;;  %v317_v39 = vld [vmem:[%s3197_s11 + $0x1d0] sm:$0xff] }
  0xef   : > { %v2521_v45 = vpop.eup %2520  ;;  %v1890_v49 = vmul.f32 %v2519_v34, %v3512_v11  ;;  %2530 = vrcp.f32 %v1571_v33  ;;  %v1389_v53 = vmul.f32 1.442695, %v1221_v38  ;;  %v1013_v54 = vpop.f32.mrf.mxu2  ;;  %v285_v38 = vld [vmem:[%s3197_s11 + $0xd0] sm:$0xff] }
  0xf0   : > { %v2523_v48 = vpop.eup %2522  ;;  %2532 = vrcp.f32 %v1603_v42  ;;  %v1635_v20 = vadd.f32 1.0, %v2521_v45  ;;  %v1109_v57 = vpop.f32.mrf.mxu3  ;;  %v3607_v60 = vadd.f32 %v3335_v4, %v1013_v54  ;;  %v381_v42 = vld [vmem:[%s3197_s11 + $0x3d0] sm:$0xff] }
  0xf1   : > { %v2525_v58 = vpop.eup %2524  ;;  %2018 = vst [vmem:[%s3414_s4 + $0x228] sm:$0xff] %v1890_v49  ;;  %v1667_v59 = vadd.f32 1.0, %v2523_v48  ;;  %2534 = vpow2.f32 %v1451_v41  ;;  %v3610_v11 = vadd.f32 %v3335_v4, %v1109_v57  ;;  %v824_v61 = vpop.f32.mrf.mxu0 }
  0xf2   : > { %v920_v50 = vpop.f32.mrf.mxu1  ;;  %v2527_v1 = vpop.eup %2526  ;;  %2536 = vrcp.f32 %v1635_v20  ;;  %v1572_v19 = vadd.f32 1.0, %v2525_v58  ;;  %v3615_v2 = vadd.f32 %v3335_v4, %v824_v61  ;;  %v1253_v7 = vsub.f32 0.0, %v3607_v60 }
  0xf3   : > { %v3618_v3 = vadd.f32 %v3335_v4, %v920_v50  ;;  %v2529_v6 = vpop.eup %2528  ;;  %v1922_v55 = vmul.f32 %v2527_v1, %v3515_v62  ;;  %2538 = vrcp.f32 %v1667_v59  ;;  %v1285_v8 = vsub.f32 0.0, %v3610_v11  ;;  %2225 = vmatmul.msk.f32.gmra.mxu0 %vm395_vm0, %v284_v63  ;;  %2257 = vmatmul.msk.f32.gmra.mxu1 %vm395_vm0, %v316_v0 }
  0xf4   : > { %2540 = vrcp.f32 %v1572_v19  ;;  %v1604_v13 = vadd.f32 1.0, %v2529_v6  ;;  %v1190_v14 = vsub.f32 0.0, %v3615_v2  ;;  %v1453_v62 = vmul.f32 1.442695, %v1253_v7  ;;  %2289 = vmatmul.msk.f32.gmra.mxu2 %vm395_vm0, %v348_v25  ;;  %2321 = vmatmul.msk.f32.gmra.mxu3 %vm395_vm0, %v380_v26 }
  0xf5   : > { %v1222_v9 = vsub.f32 0.0, %v3618_v3  ;;  %v2531_v18 = vpop.eup %2530  ;;  %2050 = vst [vmem:[%s3414_s4 + $0x328] sm:$0xff] %v1922_v55  ;;  %2542 = vpow2.f32 %v1515_v46  ;;  %v1517_v22 = vmul.f32 1.442695, %v1285_v8 }
  0xf6   : > { %v2533_v24 = vpop.eup %2532  ;;  %v1827_v16 = vmul.f32 %v2531_v18, %v3521_v5  ;;  %2544 = vrcp.f32 %v1604_v13  ;;  %v1327_v29 = vmul.f32 1.442695, %v1190_v14  ;;  %v318_v18 = vld [vmem:[%s3197_s11 + $0x1d8] sm:$0xff] }
  0xf7   : > { %v2535_v17 = vpop.eup %2534  ;;  %v1859_v21 = vmul.f32 %v2533_v24, %v3524_v12  ;;  %2546 = vpow2.f32 %v1325_v52  ;;  %v1391_v30 = vmul.f32 1.442695, %v1222_v9  ;;  %v1016_v31 = vpop.f32.mrf.mxu2  ;;  %v286_v9 = vld [vmem:[%s3197_s11 + $0xd8] sm:$0xff] }
  0xf8   : > { %v2537_v23 = vpop.eup %2536  ;;  %1955 = vst [vmem:[%s3414_s4 + $0x30] sm:$0xff] %v1827_v16  ;;  %v1636_v28 = vadd.f32 1.0, %v2535_v17  ;;  %2548 = vpow2.f32 %v1389_v53  ;;  %v1112_v32 = vpop.f32.mrf.mxu3  ;;  %v3638_v12 = vadd.f32 %v3335_v4, %v1016_v31  ;;  %v350_v17 = vld [vmem:[%s3197_s11 + $0x2d8] sm:$0xff] }
  0xf9   : > { %v2539_v10 = vpop.eup %2538  ;;  %1987 = vst [vmem:[%s3414_s4 + $0x130] sm:$0xff] %v1859_v21  ;;  %v1891_v5 = vmul.f32 %v2537_v23, %v3542_v40  ;;  %2550 = vpow2.f32 %v1453_v62  ;;  %v3641_v35 = vadd.f32 %v3335_v4, %v1112_v32  ;;  %v827_v36 = vpop.f32.mrf.mxu0  ;;  %v349_v40 = vld [vmem:[%s3197_s11 + $0x2d0] sm:$0xff]  ;;  %v382_v21 = vld [vmem:[%s3197_s11 + $0x3d8] sm:$0xff] }
  0xfa   : > { %v923_v37 = vpop.f32.mrf.mxu1  ;;  %v2541_v33 = vpop.eup %2540  ;;  %v1923_v41 = vmul.f32 %v2539_v10, %v3545_v44  ;;  %2552 = vrcp.f32 %v1636_v28  ;;  %v3647_v34 = vadd.f32 %v3335_v4, %v827_v36  ;;  %v1254_v46 = vsub.f32 0.0, %v3638_v12 }
  0xfb   : > { %v2543_v45 = vpop.eup %2542  ;;  %2019 = vst [vmem:[%s3414_s4 + $0x230] sm:$0xff] %v1891_v5  ;;  %v1828_v49 = vmul.f32 %v2541_v33, %v3550_v51  ;;  %2554 = vpow2.f32 %v1517_v22  ;;  %v1286_v48 = vsub.f32 0.0, %v3641_v35  ;;  %v3658_v53 = vadd.f32 %v3335_v4, %v923_v37  ;;  %2226 = vmatmul.msk.f32.gmra.mxu0 %vm395_vm0, %v285_v38  ;;  %2258 = vmatmul.msk.f32.gmra.mxu1 %vm395_vm0, %v317_v39 }
  0xfc   : > { %v2545_v20 = vpop.eup %2544  ;;  %2051 = vst [vmem:[%s3414_s4 + $0x330] sm:$0xff] %v1923_v41  ;;  %v1668_v52 = vadd.f32 1.0, %v2543_v45  ;;  %2556 = vpow2.f32 %v1327_v29  ;;  %v1191_v44 = vsub.f32 0.0, %v3647_v34  ;;  %v1455_v57 = vmul.f32 1.442695, %v1254_v46  ;;  %2290 = vmatmul.msk.f32.gmra.mxu2 %vm395_vm0, %v349_v40  ;;  %2322 = vmatmul.msk.f32.gmra.mxu3 %vm395_vm0, %v381_v42 }
  0xfd   : > { %v2547_v51 = vpop.eup %2546  ;;  %1956 = vst [vmem:[%s3414_s4 + $0x38] sm:$0xff] %v1828_v49  ;;  %v1860_v54 = vmul.f32 %v2545_v20, %v3553_v47  ;;  %2558 = vpow2.f32 %v1391_v30  ;;  %v1519_v63 = vmul.f32 1.442695, %v1286_v48  ;;  %v1223_v19 = vsub.f32 0.0, %v3658_v53 }
  0xfe   : > { %v2549_v58 = vpop.eup %2548  ;;  %2560 = vrcp.f32 %v1668_v52  ;;  %v1573_v59 = vadd.f32 1.0, %v2547_v51  ;;  %v1329_v47 = vmul.f32 1.442695, %v1191_v44 }
  0xff   : > { %v2551_v61 = vpop.eup %2550  ;;  %1988 = vst [vmem:[%s3414_s4 + $0x138] sm:$0xff] %v1860_v54  ;;  %v1605_v50 = vadd.f32 1.0, %v2549_v58  ;;  %2562 = vpow2.f32 %v1455_v57  ;;  %v1019_v25 = vpop.f32.mrf.mxu2  ;;  %v1393_v5 = vmul.f32 1.442695, %v1223_v19  ;;  %v287_v54 = vld [vmem:[%s3197_s11 + $0xe0] sm:$0xff] }
 0x100   : > { %v2553_v0 = vpop.eup %2552  ;;  %2564 = vrcp.f32 %v1573_v59  ;;  %v1637_v1 = vadd.f32 1.0, %v2551_v61  ;;  %v1115_v26 = vpop.f32.mrf.mxu3  ;;  %v3670_v7 = vadd.f32 %v3335_v4, %v1019_v25  ;;  %v319_v57 = vld [vmem:[%s3197_s11 + $0x1e0] sm:$0xff] }
 0x101   : > { %v2555_v6 = vpop.eup %2554  ;;  %v1892_v55 = vmul.f32 %v2553_v0, %v3575_v56  ;;  %2566 = vrcp.f32 %v1605_v50  ;;  %v3673_v8 = vadd.f32 %v3335_v4, %v1115_v26  ;;  %v830_v13 = vpop.f32.mrf.mxu0  ;;  %v351_v50 = vld [vmem:[%s3197_s11 + $0x2e0] sm:$0xff] }
 0x102   : > { %v926_v14 = vpop.f32.mrf.mxu1  ;;  %v2557_v62 = vpop.eup %2556  ;;  %2568 = vrcp.f32 %v1637_v1  ;;  %v1669_v24 = vadd.f32 1.0, %v2555_v6  ;;  %v3678_v16 = vadd.f32 %v3335_v4, %v830_v13  ;;  %v1255_v28 = vsub.f32 0.0, %v3670_v7 }
 0x103   : > { %v3681_v56 = vadd.f32 %v3335_v4, %v926_v14  ;;  %v2559_v22 = vpop.eup %2558  ;;  %2020 = vst [vmem:[%s3414_s4 + $0x238] sm:$0xff] %v1892_v55  ;;  %v1574_v23 = vadd.f32 1.0, %v2557_v62  ;;  %2570 = vpow2.f32 %v1519_v63  ;;  %v1287_v29 = vsub.f32 0.0, %v3673_v8  ;;  %2227 = vmatmul.msk.f32.gmra.mxu0 %vm395_vm0, %v286_v9  ;;  %2259 = vmatmul.msk.f32.gmra.mxu1 %vm395_vm0, %v318_v18  ;;  %v383_v63 = vld [vmem:[%s3197_s11 + $0x3e0] sm:$0xff] }
 0x104   : > { %v2561_v30 = vpop.eup %2560  ;;  %2572 = vrcp.f32 %v1669_v24  ;;  %v1606_v31 = vadd.f32 1.0, %v2559_v22  ;;  %v1192_v32 = vsub.f32 0.0, %v3678_v16  ;;  %2291 = vmatmul.msk.f32.gmra.mxu2 %vm395_vm0, %v350_v17  ;;  %2323 = vmatmul.msk.f32.gmra.mxu3 %vm395_vm0, %v382_v21  ;;  %v1457_v38 = vmul.f32 1.442695, %v1255_v28 }
 0x105   : > { %v2563_v4 = vpop.eup %2562  ;;  %v1924_v10 = vmul.f32 %v2561_v30, %v3578_v15  ;;  %2574 = vrcp.f32 %v1574_v23  ;;  %v1224_v39 = vsub.f32 0.0, %v3681_v56  ;;  %v1521_v40 = vmul.f32 1.442695, %v1287_v29 }
 0x106   : > { %v2565_v36 = vpop.eup %2564  ;;  %2576 = vrcp.f32 %v1606_v31  ;;  %v1638_v37 = vadd.f32 1.0, %v2563_v4  ;;  %v1331_v45 = vmul.f32 1.442695, %v1192_v32 }
 0x107   : > { %v2567_v33 = vpop.eup %2566  ;;  %2052 = vst [vmem:[%s3414_s4 + $0x338] sm:$0xff] %v1924_v10  ;;  %v1829_v41 = vmul.f32 %v2565_v36, %v3584_v27  ;;  %2578 = vpow2.f32 %v1329_v47  ;;  %v1022_v49 = vpop.f32.mrf.mxu2  ;;  %v3700_v27 = vld [vmem:[#allocation6] ss:$0 sm:$0xff]  ;;  %v288_v10 = vld [vmem:[%s3197_s11 + $0xe8] sm:$0xff] }
 0x108   : > { %v2569_v15 = vpop.eup %2568  ;;  %v1861_v42 = vmul.f32 %v2567_v33, %v3587_v43  ;;  %2580 = vrcp.f32 %v1638_v37  ;;  %v1118_v46 = vpop.f32.mrf.mxu3  ;;  %v3703_v52 = vadd.f32 %v3700_v27, %v1022_v49  ;;  %v352_v33 = vld [vmem:[%s3197_s11 + $0x2e8] sm:$0xff] }
 0x109   : > { %v2571_v48 = vpop.eup %2570  ;;  %1957 = vst [vmem:[%s3414_s4 + $0x40] sm:$0xff] %v1829_v41  ;;  %v1893_v20 = vmul.f32 %v2569_v15, %v3607_v60  ;;  %2582 = vpow2.f32 %v1393_v5  ;;  %v3706_v43 = vadd.f32 %v3700_v27, %v1118_v46  ;;  %v833_v44 = vpop.f32.mrf.mxu0  ;;  %v1395_v60 = vmul.f32 1.442695, %v1224_v39  ;;  %v320_v5 = vld [vmem:[%s3197_s11 + $0x1e8] sm:$0xff] }
 0x10a   : > { %v929_v51 = vpop.f32.mrf.mxu1  ;;  %v2573_v58 = vpop.eup %2572  ;;  %1989 = vst [vmem:[%s3414_s4 + $0x140] sm:$0xff] %v1861_v42  ;;  %v1670_v59 = vadd.f32 1.0, %v2571_v48  ;;  %2584 = vpow2.f32 %v1457_v38  ;;  %v3712_v61 = vadd.f32 %v3700_v27, %v833_v44  ;;  %v1256_v47 = vsub.f32 0.0, %v3703_v52  ;;  %v384_v41 = vld [vmem:[%s3197_s11 + $0x3e8] sm:$0xff] }
 0x10b   : > { %v2575_v0 = vpop.eup %2574  ;;  %2021 = vst [vmem:[%s3414_s4 + $0x240] sm:$0xff] %v1893_v20  ;;  %v1925_v1 = vmul.f32 %v2573_v58, %v3610_v11  ;;  %2586 = vpow2.f32 %v1521_v40  ;;  %v1288_v19 = vsub.f32 0.0, %v3706_v43  ;;  %v3723_v55 = vadd.f32 %v3700_v27, %v929_v51  ;;  %2228 = vmatmul.msk.f32.gmra.mxu0 %vm395_vm0, %v287_v54  ;;  %2260 = vmatmul.msk.f32.gmra.mxu1 %vm395_vm0, %v319_v57 }
 0x10c   : > { %v2577_v25 = vpop.eup %2576  ;;  %v1830_v26 = vmul.f32 %v2575_v0, %v3615_v2  ;;  %2588 = vrcp.f32 %v1670_v59  ;;  %v1193_v6 = vsub.f32 0.0, %v3712_v61  ;;  %v1459_v14 = vmul.f32 1.442695, %v1256_v47  ;;  %2292 = vmatmul.msk.f32.gmra.mxu2 %vm395_vm0, %v351_v50  ;;  %2324 = vmatmul.msk.f32.gmra.mxu3 %vm395_vm0, %v383_v63 }
 0x10d   : > { %v2579_v11 = vpop.eup %2578  ;;  %2053 = vst [vmem:[%s3414_s4 + $0x340] sm:$0xff] %v1925_v1  ;;  %v1862_v13 = vmul.f32 %v2577_v25, %v3618_v3  ;;  %2590 = vpow2.f32 %v1331_v45  ;;  %v1523_v9 = vmul.f32 1.442695, %v1288_v19  ;;  %v1225_v22 = vsub.f32 0.0, %v3723_v55 }
 0x10e   : > { %v2581_v2 = vpop.eup %2580  ;;  %1958 = vst [vmem:[%s3414_s4 + $0x48] sm:$0xff] %v1830_v26  ;;  %v1575_v18 = vadd.f32 1.0, %v2579_v11  ;;  %2592 = vpow2.f32 %v1395_v60  ;;  %v1333_v21 = vmul.f32 1.442695, %v1193_v6 }
 0x10f   : > { %v2583_v62 = vpop.eup %2582  ;;  %1990 = vst [vmem:[%s3414_s4 + $0x148] sm:$0xff] %v1862_v13  ;;  %v1894_v24 = vmul.f32 %v2581_v2, %v3638_v12  ;;  %2594 = vpow2.f32 %v1459_v14  ;;  %v1025_v23 = vpop.f32.mrf.mxu2  ;;  %v321_v2 = vld [vmem:[%s3197_s11 + $0x1f0] sm:$0xff] }
 0x110   : > { %v2585_v17 = vpop.eup %2584  ;;  %2596 = vrcp.f32 %v1575_v18  ;;  %v1607_v3 = vadd.f32 1.0, %v2583_v62  ;;  %v1121_v28 = vpop.f32.mrf.mxu3  ;;  %v3737_v31 = vadd.f32 %v3700_v27, %v1025_v23 }
 0x111   : > { %v2587_v29 = vpop.eup %2586  ;;  %2022 = vst [vmem:[%s3414_s4 + $0x248] sm:$0xff] %v1894_v24  ;;  %v1639_v30 = vadd.f32 1.0, %v2585_v17  ;;  %2598 = vpow2.f32 %v1523_v9  ;;  %v3740_v12 = vadd.f32 %v3700_v27, %v1121_v28  ;;  %v836_v32 = vpop.f32.mrf.mxu0  ;;  %v289_v9 = vld [vmem:[%s3197_s11 + $0xf0] sm:$0xff] }
 0x112   : > { %v932_v4 = vpop.f32.mrf.mxu1  ;;  %v2589_v36 = vpop.eup %2588  ;;  %2600 = vrcp.f32 %v1607_v3  ;;  %v1671_v37 = vadd.f32 1.0, %v2587_v29  ;;  %v3745_v38 = vadd.f32 %v3700_v27, %v836_v32  ;;  %v1257_v42 = vsub.f32 0.0, %v3737_v31  ;;  %v353_v17 = vld [vmem:[%s3197_s11 + $0x2f0] sm:$0xff] }
 0x113   : > { %v3748_v39 = vadd.f32 %v3700_v27, %v932_v4  ;;  %v2591_v40 = vpop.eup %2590  ;;  %v1926_v15 = vmul.f32 %v2589_v36, %v3641_v35  ;;  %2602 = vrcp.f32 %v1639_v30  ;;  %v1289_v45 = vsub.f32 0.0, %v3740_v12  ;;  %2229 = vmatmul.msk.f32.gmra.mxu0 %vm395_vm0, %v288_v10  ;;  %2261 = vmatmul.msk.f32.gmra.mxu1 %vm395_vm0, %v320_v5  ;;  %v385_v3 = vld [vmem:[%s3197_s11 + $0x3f0] sm:$0xff] }
 0x114   : > { %v2593_v49 = vpop.eup %2592  ;;  %2604 = vrcp.f32 %v1671_v37  ;;  %v1576_v46 = vadd.f32 1.0, %v2591_v40  ;;  %v1194_v48 = vsub.f32 0.0, %v3745_v38  ;;  %v1397_v35 = vmul.f32 1.442695, %v1225_v22  ;;  %2293 = vmatmul.msk.f32.gmra.mxu2 %vm395_vm0, %v352_v33  ;;  %2325 = vmatmul.msk.f32.gmra.mxu3 %vm395_vm0, %v384_v41 }
 0x115   : > { %v1226_v20 = vsub.f32 0.0, %v3748_v39  ;;  %v2595_v44 = vpop.eup %2594  ;;  %2054 = vst [vmem:[%s3414_s4 + $0x348] sm:$0xff] %v1926_v15  ;;  %v1608_v51 = vadd.f32 1.0, %v2593_v49  ;;  %2606 = vpow2.f32 %v1333_v21  ;;  %v1461_v60 = vmul.f32 1.442695, %v1257_v42 }
 0x116   : > { %v2597_v54 = vpop.eup %2596  ;;  %2608 = vrcp.f32 %v1576_v46  ;;  %v1640_v57 = vadd.f32 1.0, %v2595_v44  ;;  %v1525_v50 = vmul.f32 1.442695, %v1289_v45  ;;  %v1335_v1 = vmul.f32 1.442695, %v1194_v48 }
 0x117   : > { %v2599_v58 = vpop.eup %2598  ;;  %v1831_v59 = vmul.f32 %v2597_v54, %v3647_v34  ;;  %2610 = vrcp.f32 %v1608_v51  ;;  %v1399_v47 = vmul.f32 1.442695, %v1226_v20  ;;  %v1028_v19 = vpop.f32.mrf.mxu2  ;;  %v290_v51 = vld [vmem:[%s3197_s11 + $0xf8] sm:$0xff] }
 0x118   : > { %v2601_v63 = vpop.eup %2600  ;;  %2612 = vrcp.f32 %v1640_v57  ;;  %v1672_v0 = vadd.f32 1.0, %v2599_v58  ;;  %v1124_v25 = vpop.f32.mrf.mxu3  ;;  %v3766_v34 = vadd.f32 %v3700_v27, %v1028_v19 }
 0x119   : > { %v2603_v26 = vpop.eup %2602  ;;  %1959 = vst [vmem:[%s3414_s4 + $0x50] sm:$0xff] %v1831_v59  ;;  %v1863_v6 = vmul.f32 %v2601_v63, %v3658_v53  ;;  %2614 = vpow2.f32 %v1397_v35  ;;  %v3769_v11 = vadd.f32 %v3700_v27, %v1124_v25  ;;  %v839_v13 = vpop.f32.mrf.mxu0  ;;  %v322_v35 = vld [vmem:[%s3197_s11 + $0x1f8] sm:$0xff] }
 0x11a   : > { %v935_v14 = vpop.f32.mrf.mxu1  ;;  %v2605_v18 = vpop.eup %2604  ;;  %v1895_v62 = vmul.f32 %v2603_v26, %v3670_v7  ;;  %2616 = vrcp.f32 %v1672_v0  ;;  %v3775_v24 = vadd.f32 %v3700_v27, %v839_v13  ;;  %v1258_v23 = vsub.f32 0.0, %v3766_v34  ;;  %v354_v59 = vld [vmem:[%s3197_s11 + $0x2f8] sm:$0xff] }
 0x11b   : > { %v3778_v53 = vadd.f32 %v3700_v27, %v935_v14  ;;  %v2607_v21 = vpop.eup %2606  ;;  %1991 = vst [vmem:[%s3414_s4 + $0x150] sm:$0xff] %v1863_v6  ;;  %v1927_v22 = vmul.f32 %v2605_v18, %v3673_v8  ;;  %2618 = vpow2.f32 %v1461_v60  ;;  %v1290_v28 = vsub.f32 0.0, %v3769_v11  ;;  %2230 = vmatmul.msk.f32.gmra.mxu0 %vm395_vm0, %v289_v9  ;;  %2262 = vmatmul.msk.f32.gmra.mxu1 %vm395_vm0, %v321_v2  ;;  %v386_v60 = vld [vmem:[%s3197_s11 + $0x3f8] sm:$0xff] }
 0x11c   : > { %v2609_v7 = vpop.eup %2608  ;;  %2023 = vst [vmem:[%s3414_s4 + $0x250] sm:$0xff] %v1895_v62  ;;  %v1577_v29 = vadd.f32 1.0, %v2607_v21  ;;  %2620 = vpow2.f32 %v1525_v50  ;;  %v1195_v30 = vsub.f32 0.0, %v3775_v24  ;;  %v1463_v10 = vmul.f32 1.442695, %v1258_v23  ;;  %2294 = vmatmul.msk.f32.gmra.mxu2 %vm395_vm0, %v353_v17  ;;  %2326 = vmatmul.msk.f32.gmra.mxu3 %vm395_vm0, %v385_v3 }
 0x11d   : > { %v1227_v32 = vsub.f32 0.0, %v3778_v53  ;;  %v2611_v4 = vpop.eup %2610  ;;  %2055 = vst [vmem:[%s3414_s4 + $0x350] sm:$0xff] %v1927_v22  ;;  %v1832_v8 = vmul.f32 %v2609_v7, %v3678_v16  ;;  %2622 = vpow2.f32 %v1335_v1  ;;  %v1527_v5 = vmul.f32 1.442695, %v1290_v28 }
 0x11e   : > { %v2613_v36 = vpop.eup %2612  ;;  %v1864_v37 = vmul.f32 %v2611_v4, %v3681_v56  ;;  %2624 = vrcp.f32 %v1577_v29  ;;  %v1337_v40 = vmul.f32 1.442695, %v1195_v30 }
 0x11f   : > { %v2615_v33 = vpop.eup %2614  ;;  %1960 = vst [vmem:[%s3414_s4 + $0x58] sm:$0xff] %v1832_v8  ;;  %v1896_v41 = vmul.f32 %v2613_v36, %v3703_v52  ;;  %2626 = vpow2.f32 %v1399_v47  ;;  %v1401_v42 = vmul.f32 1.442695, %v1227_v32  ;;  %v1031_v45 = vpop.f32.mrf.mxu2 }
 0x120   : > { %v2617_v16 = vpop.eup %2616  ;;  %1992 = vst [vmem:[%s3414_s4 + $0x158] sm:$0xff] %v1864_v37  ;;  %v1609_v15 = vadd.f32 1.0, %v2615_v33  ;;  %2628 = vpow2.f32 %v1463_v10  ;;  %v1127_v49 = vpop.f32.mrf.mxu3  ;;  %v3802_v52 = vadd.f32 %v3700_v27, %v1031_v45 }
 0x121   : > { %v2619_v46 = vpop.eup %2618  ;;  %2024 = vst [vmem:[%s3414_s4 + $0x258] sm:$0xff] %v1896_v41  ;;  %v1928_v56 = vmul.f32 %v2617_v16, %v3706_v43  ;;  %2630 = vpow2.f32 %v1527_v5  ;;  %v3805_v48 = vadd.f32 %v3700_v27, %v1127_v49  ;;  %v842_v20 = vpop.f32.mrf.mxu0 }
 0x122   : > { %v938_v44 = vpop.f32.mrf.mxu1  ;;  %v2621_v54 = vpop.eup %2620  ;;  %2632 = vrcp.f32 %v1609_v15  ;;  %v1641_v57 = vadd.f32 1.0, %v2619_v46  ;;  %v3810_v58 = vadd.f32 %v3700_v27, %v842_v20  ;;  %v1259_v0 = vsub.f32 0.0, %v3802_v52 }
 0x123   : > { %v3813_v43 = vadd.f32 %v3700_v27, %v938_v44  ;;  %v2623_v50 = vpop.eup %2622  ;;  %2056 = vst [vmem:[%s3414_s4 + $0x358] sm:$0xff] %v1928_v56  ;;  %v1673_v63 = vadd.f32 1.0, %v2621_v54  ;;  %2634 = vpow2.f32 %v1337_v40  ;;  %v1291_v1 = vsub.f32 0.0, %v3805_v48  ;;  %2231 = vmatmul.msk.f32.gmra.mxu0 %vm395_vm0, %v290_v51  ;;  %2263 = vmatmul.msk.f32.gmra.mxu1 %vm395_vm0, %v322_v35 }
 0x124   : > { %v2625_v47 = vpop.eup %2624  ;;  %2636 = vrcp.f32 %v1641_v57  ;;  %v1578_v19 = vadd.f32 1.0, %v2623_v50  ;;  %v1196_v25 = vsub.f32 0.0, %v3810_v58  ;;  %2295 = vmatmul.msk.f32.gmra.mxu2 %vm395_vm0, %v354_v59  ;;  %2327 = vmatmul.msk.f32.gmra.mxu3 %vm395_vm0, %v386_v60  ;;  %v1465_v62 = vmul.f32 1.442695, %v1259_v0 }
 0x125   : > { %v1228_v26 = vsub.f32 0.0, %v3813_v43  ;;  %v2627_v6 = vpop.eup %2626  ;;  %v1833_v13 = vmul.f32 %v2625_v47, %v3712_v61  ;;  %2638 = vrcp.f32 %v1673_v63  ;;  %v1529_v17 = vmul.f32 1.442695, %v1291_v1 }
 0x126   : > { %v2629_v14 = vpop.eup %2628  ;;  %2640 = vrcp.f32 %v1578_v19  ;;  %v1610_v9 = vadd.f32 1.0, %v2627_v6  ;;  %v1339_v22 = vmul.f32 1.442695, %v1196_v25 }
 0x127   : > { %v2631_v2 = vpop.eup %2630  ;;  %1961 = vst [vmem:[%s3414_s4 + $0x60] sm:$0xff] %v1833_v13  ;;  %v1642_v18 = vadd.f32 1.0, %v2629_v14  ;;  %2642 = vpow2.f32 %v1401_v42  ;;  %v1403_v23 = vmul.f32 1.442695, %v1228_v26  ;;  %v1034_v61 = vpop.f32.mrf.mxu2 }
 0x128   : > { %v2633_v3 = vpop.eup %2632  ;;  %2644 = vrcp.f32 %v1610_v9  ;;  %v1674_v21 = vadd.f32 1.0, %v2631_v2  ;;  %v1130_v28 = vpop.f32.mrf.mxu3  ;;  %v3830_v30 = vadd.f32 %v3700_v27, %v1034_v61 }
 0x129   : > { %v2635_v7 = vpop.eup %2634  ;;  %v1865_v29 = vmul.f32 %v2633_v3, %v3723_v55  ;;  %2646 = vrcp.f32 %v1642_v18  ;;  %v3833_v32 = vadd.f32 %v3700_v27, %v1130_v28  ;;  %v845_v4 = vpop.f32.mrf.mxu0 }
 0x12a   : > { %v941_v8 = vpop.f32.mrf.mxu1  ;;  %v2637_v10 = vpop.eup %2636  ;;  %2648 = vrcp.f32 %v1674_v21  ;;  %v1579_v5 = vadd.f32 1.0, %v2635_v7  ;;  %v3836_v36 = vadd.f32 %v3700_v27, %v845_v4  ;;  %v1260_v41 = vsub.f32 0.0, %v3830_v30 }
 0x12b   : > { %v3839_v37 = vadd.f32 %v3700_v27, %v941_v8  ;;  %v2639_v55 = vpop.eup %2638  ;;  %1993 = vst [vmem:[%s3414_s4 + $0x160] sm:$0xff] %v1865_v29  ;;  %v1897_v33 = vmul.f32 %v2637_v10, %v3737_v31  ;;  %2650 = vpow2.f32 %v1465_v62  ;;  %v1292_v40 = vsub.f32 0.0, %v3833_v32 }
 0x12c   : > { %v2641_v16 = vpop.eup %2640  ;;  %v1929_v15 = vmul.f32 %v2639_v55, %v3740_v12  ;;  %2652 = vrcp.f32 %v1579_v5  ;;  %v1197_v42 = vsub.f32 0.0, %v3836_v36  ;;  %v1467_v31 = vmul.f32 1.442695, %v1260_v41 }
 0x12d   : > { %v1229_v45 = vsub.f32 0.0, %v3839_v37  ;;  %v2643_v49 = vpop.eup %2642  ;;  %2025 = vst [vmem:[%s3414_s4 + $0x260] sm:$0xff] %v1897_v33  ;;  %v1834_v46 = vmul.f32 %v2641_v16, %v3745_v38  ;;  %2654 = vpow2.f32 %v1529_v17  ;;  %v1531_v44 = vmul.f32 1.442695, %v1292_v40 }
 0x12e   : > { %v2645_v56 = vpop.eup %2644  ;;  %2057 = vst [vmem:[%s3414_s4 + $0x360] sm:$0xff] %v1929_v15  ;;  %v1611_v20 = vadd.f32 1.0, %v2643_v49  ;;  %2656 = vpow2.f32 %v1339_v22  ;;  %v1341_v35 = vmul.f32 1.442695, %v1197_v42 }
 0x12f   : > { %v2647_v51 = vpop.eup %2646  ;;  %1962 = vst [vmem:[%s3414_s4 + $0x68] sm:$0xff] %v1834_v46  ;;  %v1866_v12 = vmul.f32 %v2645_v56, %v3748_v39  ;;  %2658 = vpow2.f32 %v1403_v23  ;;  %v1405_v38 = vmul.f32 1.442695, %v1229_v45  ;;  %v1037_v59 = vpop.f32.mrf.mxu2 }
 0x130   : > { %v2649_v54 = vpop.eup %2648  ;;  %v1898_v57 = vmul.f32 %v2647_v51, %v3766_v34  ;;  %2660 = vrcp.f32 %v1611_v20  ;;  %v1133_v60 = vpop.f32.mrf.mxu3  ;;  %v3857_v0 = vadd.f32 %v3700_v27, %v1037_v59 }
 0x131   : > { %v2651_v50 = vpop.eup %2650  ;;  %1994 = vst [vmem:[%s3414_s4 + $0x168] sm:$0xff] %v1866_v12  ;;  %v1930_v63 = vmul.f32 %v2649_v54, %v3769_v11  ;;  %2662 = vpow2.f32 %v1467_v31  ;;  %v3860_v39 = vadd.f32 %v3700_v27, %v1133_v60  ;;  %v848_v1 = vpop.f32.mrf.mxu0 }
 0x132   : > { %v944_v47 = vpop.f32.mrf.mxu1  ;;  %v2653_v19 = vpop.eup %2652  ;;  %2026 = vst [vmem:[%s3414_s4 + $0x268] sm:$0xff] %v1898_v57  ;;  %v1643_v34 = vadd.f32 1.0, %v2651_v50  ;;  %2664 = vpow2.f32 %v1531_v44  ;;  %v3864_v25 = vadd.f32 %v3700_v27, %v848_v1  ;;  %v1261_v13 = vsub.f32 0.0, %v3857_v0 }
 0x133   : > { %v3867_v26 = vadd.f32 %v3700_v27, %v944_v47  ;;  %v2655_v11 = vpop.eup %2654  ;;  %2058 = vst [vmem:[%s3414_s4 + $0x368] sm:$0xff] %v1930_v63  ;;  %v1835_v6 = vmul.f32 %v2653_v19, %v3775_v24  ;;  %2666 = vpow2.f32 %v1341_v35  ;;  %v1293_v14 = vsub.f32 0.0, %v3860_v39 }
 0x134   : > { %v2657_v9 = vpop.eup %2656  ;;  %2668 = vrcp.f32 %v1643_v34  ;;  %v1675_v2 = vadd.f32 1.0, %v2655_v11  ;;  %v1198_v18 = vsub.f32 0.0, %v3864_v25  ;;  %v1469_v21 = vmul.f32 1.442695, %v1261_v13 }
 0x135   : > { %v1230_v62 = vsub.f32 0.0, %v3867_v26  ;;  %v2659_v17 = vpop.eup %2658  ;;  %1963 = vst [vmem:[%s3414_s4 + $0x70] sm:$0xff] %v1835_v6  ;;  %v1580_v3 = vadd.f32 1.0, %v2657_v9  ;;  %2670 = vpow2.f32 %v1405_v38  ;;  %v1533_v28 = vmul.f32 1.442695, %v1293_v14 }
 0x136   : > { %v2661_v22 = vpop.eup %2660  ;;  %2672 = vrcp.f32 %v1675_v2  ;;  %v1612_v24 = vadd.f32 1.0, %v2659_v17  ;;  %v1343_v4 = vmul.f32 1.442695, %v1198_v18 }
 0x137   : > { %v2663_v23 = vpop.eup %2662  ;;  %v1867_v61 = vmul.f32 %v2661_v22, %v3778_v53  ;;  %2674 = vrcp.f32 %v1580_v3  ;;  %v1407_v8 = vmul.f32 1.442695, %v1230_v62  ;;  %v1040_v10 = vpop.f32.mrf.mxu2 }
 0x138   : > { %v2665_v7 = vpop.eup %2664  ;;  %2676 = vrcp.f32 %v1612_v24  ;;  %v1644_v29 = vadd.f32 1.0, %v2663_v23  ;;  %v1136_v5 = vpop.f32.mrf.mxu3  ;;  %v3879_v41 = vadd.f32 %v3700_v27, %v1040_v10 }
 0x139   : > { %v2667_v55 = vpop.eup %2666  ;;  %1995 = vst [vmem:[%s3414_s4 + $0x170] sm:$0xff] %v1867_v61  ;;  %v1676_v33 = vadd.f32 1.0, %v2665_v7  ;;  %2678 = vpow2.f32 %v1469_v21  ;;  %v3882_v40 = vadd.f32 %v3700_v27, %v1136_v5  ;;  %v851_v53 = vpop.f32.mrf.mxu0 }
 0x13a   : > { %v947_v16 = vpop.f32.mrf.mxu1  ;;  %v2669_v15 = vpop.eup %2668  ;;  %2680 = vrcp.f32 %v1644_v29  ;;  %v1581_v42 = vadd.f32 1.0, %v2667_v55  ;;  %v3885_v45 = vadd.f32 %v3700_v27, %v851_v53  ;;  %v1262_v56 = vsub.f32 0.0, %v3879_v41 }
 0x13b   : > { %v3888_v49 = vadd.f32 %v3700_v27, %v947_v16  ;;  %v2671_v46 = vpop.eup %2670  ;;  %v1899_v31 = vmul.f32 %v2669_v15, %v3802_v52  ;;  %2682 = vrcp.f32 %v1676_v33  ;;  %v1294_v20 = vsub.f32 0.0, %v3882_v40 }
 0x13c   : > { %v2673_v44 = vpop.eup %2672  ;;  %2684 = vrcp.f32 %v1581_v42  ;;  %v1613_v51 = vadd.f32 1.0, %v2671_v46  ;;  %v1199_v12 = vsub.f32 0.0, %v3885_v45  ;;  %v1471_v52 = vmul.f32 1.442695, %v1262_v56 }
 0x13d   : > { %v1231_v35 = vsub.f32 0.0, %v3888_v49  ;;  %v2675_v54 = vpop.eup %2674  ;;  %2027 = vst [vmem:[%s3414_s4 + $0x270] sm:$0xff] %v1899_v31  ;;  %v1931_v57 = vmul.f32 %v2673_v44, %v3805_v48  ;;  %2686 = vpow2.f32 %v1533_v28  ;;  %v1535_v63 = vmul.f32 1.442695, %v1294_v20 }
 0x13e   : > { %v2677_v38 = vpop.eup %2676  ;;  %v1836_v59 = vmul.f32 %v2675_v54, %v3810_v58  ;;  %2688 = vrcp.f32 %v1613_v51  ;;  %v1345_v19 = vmul.f32 1.442695, %v1199_v12 }
 0x13f   : > { %v2679_v60 = vpop.eup %2678  ;;  %2059 = vst [vmem:[%s3414_s4 + $0x370] sm:$0xff] %v1931_v57  ;;  %v1868_v50 = vmul.f32 %v2677_v38, %v3813_v43  ;;  %2690 = vpow2.f32 %v1343_v4  ;;  %v1409_v34 = vmul.f32 1.442695, %v1231_v35  ;;  %v1043_v48 = vpop.f32.mrf.mxu2 }
 0x140   : > { %v2681_v1 = vpop.eup %2680  ;;  %1964 = vst [vmem:[%s3414_s4 + $0x78] sm:$0xff] %v1836_v59  ;;  %v1645_v47 = vadd.f32 1.0, %v2679_v60  ;;  %2692 = vpow2.f32 %v1407_v8  ;;  %v1139_v11 = vpop.f32.mrf.mxu3  ;;  %v3904_v13 = vadd.f32 %v3700_v27, %v1043_v48 }
 0x141   : > { %v2683_v6 = vpop.eup %2682  ;;  %1996 = vst [vmem:[%s3414_s4 + $0x178] sm:$0xff] %v1868_v50  ;;  %v1900_v58 = vmul.f32 %v2681_v1, %v3830_v30  ;;  %2694 = vpow2.f32 %v1471_v52  ;;  %v3907_v43 = vadd.f32 %v3700_v27, %v1139_v11  ;;  %v854_v14 = vpop.f32.mrf.mxu0 }
 0x142   : > { %v950_v9 = vpop.f32.mrf.mxu1  ;;  %v2685_v2 = vpop.eup %2684  ;;  %v1932_v18 = vmul.f32 %v2683_v6, %v3833_v32  ;;  %2696 = vrcp.f32 %v1645_v47  ;;  %v3911_v62 = vadd.f32 %v3700_v27, %v854_v14  ;;  %v1263_v3 = vsub.f32 0.0, %v3904_v13 }
 0x143   : > { %v2687_v17 = vpop.eup %2686  ;;  %2028 = vst [vmem:[%s3414_s4 + $0x278] sm:$0xff] %v1900_v58  ;;  %v1837_v30 = vmul.f32 %v2685_v2, %v3836_v36  ;;  %2698 = vpow2.f32 %v1535_v63  ;;  %v1295_v21 = vsub.f32 0.0, %v3907_v43  ;;  %v3920_v23 = vadd.f32 %v3700_v27, %v950_v9 }
 0x144   : > { %v2689_v22 = vpop.eup %2688  ;;  %2060 = vst [vmem:[%s3414_s4 + $0x378] sm:$0xff] %v1932_v18  ;;  %v1677_v24 = vadd.f32 1.0, %v2687_v17  ;;  %2700 = vpow2.f32 %v1345_v19  ;;  %v1200_v32 = vsub.f32 0.0, %v3911_v62  ;;  %v1473_v36 = vmul.f32 1.442695, %v1263_v3 }
 0x145   : > { %v2691_v61 = vpop.eup %2690  ;;  %1965 = vst [vmem:[%s3414_s4 + $0x80] sm:$0xff] %v1837_v30  ;;  %v1869_v28 = vmul.f32 %v2689_v22, %v3839_v37  ;;  %2702 = vpow2.f32 %v1409_v34  ;;  %v1537_v10 = vmul.f32 1.442695, %v1295_v21  ;;  %v1232_v53 = vsub.f32 0.0, %v3920_v23 }
 0x146   : > { %v2693_v7 = vpop.eup %2692  ;;  %2704 = vrcp.f32 %v1677_v24  ;;  %v1582_v29 = vadd.f32 1.0, %v2691_v61  ;;  %v1347_v33 = vmul.f32 1.442695, %v1200_v32 }
 0x147   : > { %v2695_v4 = vpop.eup %2694  ;;  %1997 = vst [vmem:[%s3414_s4 + $0x180] sm:$0xff] %v1869_v28  ;;  %v1614_v8 = vadd.f32 1.0, %v2693_v7  ;;  %2706 = vpow2.f32 %v1473_v36  ;;  %v1046_v16 = vpop.f32.mrf.mxu2  ;;  %v1411_v1 = vmul.f32 1.442695, %v1232_v53 }
 0x148   : > { %v2697_v5 = vpop.eup %2696  ;;  %2708 = vrcp.f32 %v1582_v29  ;;  %v1646_v55 = vadd.f32 1.0, %v2695_v4  ;;  %v1142_v15 = vpop.f32.mrf.mxu3  ;;  %v3928_v46 = vadd.f32 %v3700_v27, %v1046_v16 }
 0x149   : > { %v2699_v37 = vpop.eup %2698  ;;  %v1901_v42 = vmul.f32 %v2697_v5, %v3857_v0  ;;  %2710 = vrcp.f32 %v1614_v8  ;;  %v3931_v31 = vadd.f32 %v3700_v27, %v1142_v15  ;;  %v857_v56 = vpop.f32.mrf.mxu0 }
 0x14a   : > { %v953_v20 = vpop.f32.mrf.mxu1  ;;  %v2701_v44 = vpop.eup %2700  ;;  %2712 = vrcp.f32 %v1646_v55  ;;  %v1678_v51 = vadd.f32 1.0, %v2699_v37  ;;  %v3934_v12 = vadd.f32 %v3700_v27, %v857_v56  ;;  %v1264_v57 = vsub.f32 0.0, %v3928_v46 }
 0x14b   : > { %v3937_v35 = vadd.f32 %v3700_v27, %v953_v20  ;;  %v2703_v54 = vpop.eup %2702  ;;  %2029 = vst [vmem:[%s3414_s4 + $0x280] sm:$0xff] %v1901_v42  ;;  %v1583_v0 = vadd.f32 1.0, %v2701_v44  ;;  %2714 = vpow2.f32 %v1537_v10  ;;  %v1296_v52 = vsub.f32 0.0, %v3931_v31 }
 0x14c   : > { %v2705_v38 = vpop.eup %2704  ;;  %2716 = vrcp.f32 %v1678_v51  ;;  %v1615_v59 = vadd.f32 1.0, %v2703_v54  ;;  %v1201_v60 = vsub.f32 0.0, %v3934_v12  ;;  %v1475_v34 = vmul.f32 1.442695, %v1264_v57 }
 0x14d   : > { %v2707_v50 = vpop.eup %2706  ;;  %v1933_v63 = vmul.f32 %v2705_v38, %v3860_v39  ;;  %2718 = vrcp.f32 %v1583_v0  ;;  %v1233_v48 = vsub.f32 0.0, %v3937_v35  ;;  %v1539_v58 = vmul.f32 1.442695, %v1296_v52 }
 0x14e   : > { %v2709_v47 = vpop.eup %2708  ;;  %2720 = vrcp.f32 %v1615_v59  ;;  %v1647_v19 = vadd.f32 1.0, %v2707_v50  ;;  %v1349_v39 = vmul.f32 1.442695, %v1201_v60 }
 0x14f   : > { %v2711_v11 = vpop.eup %2710  ;;  %2061 = vst [vmem:[%s3414_s4 + $0x380] sm:$0xff] %v1933_v63  ;;  %v1838_v6 = vmul.f32 %v2709_v47, %v3864_v25  ;;  %2722 = vpow2.f32 %v1347_v33  ;;  %v1049_v2 = vpop.f32.mrf.mxu2  ;;  %v1413_v32 = vmul.f32 1.442695, %v1233_v48 }
 0x150   : > { %v2713_v14 = vpop.eup %2712  ;;  %v1870_v9 = vmul.f32 %v2711_v11, %v3867_v26  ;;  %2724 = vrcp.f32 %v1647_v19  ;;  %v1145_v18 = vpop.f32.mrf.mxu3  ;;  %v3951_v3 = vadd.f32 %v3700_v27, %v1049_v2 }
 0x151   : > { %v2715_v17 = vpop.eup %2714  ;;  %1966 = vst [vmem:[%s3414_s4 + $0x88] sm:$0xff] %v1838_v6  ;;  %v1902_v30 = vmul.f32 %v2713_v14, %v3879_v41  ;;  %2726 = vpow2.f32 %v1411_v1  ;;  %v3954_v25 = vadd.f32 %v3700_v27, %v1145_v18  ;;  %v860_v21 = vpop.f32.mrf.mxu0 }
 0x152   : > { %v956_v22 = vpop.f32.mrf.mxu1  ;;  %v2717_v24 = vpop.eup %2716  ;;  %1998 = vst [vmem:[%s3414_s4 + $0x188] sm:$0xff] %v1870_v9  ;;  %v1679_v26 = vadd.f32 1.0, %v2715_v17  ;;  %2728 = vpow2.f32 %v1475_v34  ;;  %v3958_v61 = vadd.f32 %v3700_v27, %v860_v21  ;;  %v1265_v36 = vsub.f32 0.0, %v3951_v3 }
 0x153   : > { %v2719_v28 = vpop.eup %2718  ;;  %2030 = vst [vmem:[%s3414_s4 + $0x288] sm:$0xff] %v1902_v30  ;;  %v1934_v41 = vmul.f32 %v2717_v24, %v3882_v40  ;;  %2730 = vpow2.f32 %v1539_v58  ;;  %v1297_v7 = vsub.f32 0.0, %v3954_v25  ;;  %v3967_v10 = vadd.f32 %v3700_v27, %v956_v22 }
 0x154   : > { %v2721_v29 = vpop.eup %2720  ;;  %v1839_v4 = vmul.f32 %v2719_v28, %v3885_v45  ;;  %2732 = vrcp.f32 %v1679_v26  ;;  %v1202_v8 = vsub.f32 0.0, %v3958_v61  ;;  %v1477_v55 = vmul.f32 1.442695, %v1265_v36  ;;  %v3997_v36 = vld [vmem:[#allocation6] ss:$0 sm:$0xff] }
 0x155   : > { %v2723_v5 = vpop.eup %2722  ;;  %2062 = vst [vmem:[%s3414_s4 + $0x388] sm:$0xff] %v1934_v41  ;;  %v1871_v40 = vmul.f32 %v2721_v29, %v3888_v49  ;;  %2734 = vpow2.f32 %v1349_v39  ;;  %v1541_v33 = vmul.f32 1.442695, %v1297_v7  ;;  %v1234_v20 = vsub.f32 0.0, %v3967_v10 }
 0x156   : > { %v2725_v53 = vpop.eup %2724  ;;  %1967 = vst [vmem:[%s3414_s4 + $0x90] sm:$0xff] %v1839_v4  ;;  %v1584_v16 = vadd.f32 1.0, %v2723_v5  ;;  %2736 = vpow2.f32 %v1413_v32  ;;  %v1351_v56 = vmul.f32 1.442695, %v1202_v8 }
 0x157   : > { %v2727_v15 = vpop.eup %2726  ;;  %1999 = vst [vmem:[%s3414_s4 + $0x190] sm:$0xff] %v1871_v40  ;;  %v1903_v45 = vmul.f32 %v2725_v53, %v3904_v13  ;;  %2738 = vpow2.f32 %v1477_v55  ;;  %v1052_v49 = vpop.f32.mrf.mxu2 }
 0x158   : > { %v2729_v37 = vpop.eup %2728  ;;  %2740 = vrcp.f32 %v1584_v16  ;;  %v1616_v42 = vadd.f32 1.0, %v2727_v15  ;;  %v1148_v44 = vpop.f32.mrf.mxu3  ;;  %v3977_v0 = vadd.f32 %v3700_v27, %v1052_v49 }
 0x159   : > { %v2731_v51 = vpop.eup %2730  ;;  %2031 = vst [vmem:[%s3414_s4 + $0x290] sm:$0xff] %v1903_v45  ;;  %v1648_v54 = vadd.f32 1.0, %v2729_v37  ;;  %2742 = vpow2.f32 %v1541_v33  ;;  %v3980_v57 = vadd.f32 %v3700_v27, %v1148_v44  ;;  %v863_v13 = vpop.f32.mrf.mxu0 }
 0x15a   : > { %v959_v52 = vpop.f32.mrf.mxu1  ;;  %v2733_v38 = vpop.eup %2732  ;;  %2744 = vrcp.f32 %v1616_v42  ;;  %v1680_v59 = vadd.f32 1.0, %v2731_v51  ;;  %v3983_v60 = vadd.f32 %v3700_v27, %v863_v13  ;;  %v1266_v47 = vsub.f32 0.0, %v3977_v0 }
 0x15b   : > { %v3986_v50 = vadd.f32 %v3700_v27, %v959_v52  ;;  %v2735_v63 = vpop.eup %2734  ;;  %v1935_v1 = vmul.f32 %v2733_v38, %v3907_v43  ;;  %2746 = vrcp.f32 %v1648_v54  ;;  %v1298_v19 = vsub.f32 0.0, %v3980_v57 }
 0x15c   : > { %v2737_v34 = vpop.eup %2736  ;;  %2748 = vrcp.f32 %v1680_v59  ;;  %v1585_v48 = vadd.f32 1.0, %v2735_v63  ;;  %v1203_v11 = vsub.f32 0.0, %v3983_v60  ;;  %v1415_v27 = vmul.f32 1.442695, %v1234_v20 }
 0x15d   : > { %v1235_v6 = vsub.f32 0.0, %v3986_v50  ;;  %v2739_v58 = vpop.eup %2738  ;;  %2063 = vst [vmem:[%s3414_s4 + $0x390] sm:$0xff] %v1935_v1  ;;  %v1617_v14 = vadd.f32 1.0, %v2737_v34  ;;  %2750 = vpow2.f32 %v1351_v56  ;;  %v1479_v18 = vmul.f32 1.442695, %v1266_v47 }
 0x15e   : > { %v2741_v9 = vpop.eup %2740  ;;  %2752 = vrcp.f32 %v1585_v48  ;;  %v1649_v43 = vadd.f32 1.0, %v2739_v58  ;;  %v1543_v17 = vmul.f32 1.442695, %v1298_v19  ;;  %v1353_v22 = vmul.f32 1.442695, %v1203_v11 }
 0x15f   : > { %v2743_v39 = vpop.eup %2742  ;;  %v1840_v2 = vmul.f32 %v2741_v9, %v3911_v62  ;;  %2754 = vrcp.f32 %v1617_v14  ;;  %v1417_v24 = vmul.f32 1.442695, %v1235_v6  ;;  %v1055_v26 = vpop.f32.mrf.mxu2 }
 0x160   : > { %v2745_v30 = vpop.eup %2744  ;;  %2756 = vrcp.f32 %v1649_v43  ;;  %v1681_v21 = vadd.f32 1.0, %v2743_v39  ;;  %v1151_v32 = vpop.f32.mrf.mxu3  ;;  %v4000_v62 = vadd.f32 %v3997_v36, %v1055_v26 }
 0x161   : > { %v2747_v28 = vpop.eup %2746  ;;  %1968 = vst [vmem:[%s3414_s4 + $0x98] sm:$0xff] %v1840_v2  ;;  %v1872_v41 = vmul.f32 %v2745_v30, %v3920_v23  ;;  %2758 = vpow2.f32 %v1415_v27  ;;  %v4003_v7 = vadd.f32 %v3997_v36, %v1151_v32  ;;  %v866_v29 = vpop.f32.mrf.mxu0 }
 0x162   : > { %v962_v4 = vpop.f32.mrf.mxu1  ;;  %v2749_v8 = vpop.eup %2748  ;;  %v1904_v5 = vmul.f32 %v2747_v28, %v3928_v46  ;;  %2760 = vrcp.f32 %v1681_v21  ;;  %v4007_v40 = vadd.f32 %v3997_v36, %v866_v29  ;;  %v1267_v53 = vsub.f32 0.0, %v4000_v62 }
 0x163   : > { %v4010_v23 = vadd.f32 %v3997_v36, %v962_v4  ;;  %v2751_v55 = vpop.eup %2750  ;;  %2000 = vst [vmem:[%s3414_s4 + $0x198] sm:$0xff] %v1872_v41  ;;  %v1936_v33 = vmul.f32 %v2749_v8, %v3931_v31  ;;  %2762 = vpow2.f32 %v1479_v18  ;;  %v1299_v16 = vsub.f32 0.0, %v4003_v7 }
 0x164   : > { %v2753_v15 = vpop.eup %2752  ;;  %2032 = vst [vmem:[%s3414_s4 + $0x298] sm:$0xff] %v1904_v5  ;;  %v1586_v46 = vadd.f32 1.0, %v2751_v55  ;;  %2764 = vpow2.f32 %v1543_v17  ;;  %v1204_v45 = vsub.f32 0.0, %v4007_v40  ;;  %v1481_v31 = vmul.f32 1.442695, %v1267_v53 }
 0x165   : > { %v1236_v37 = vsub.f32 0.0, %v4010_v23  ;;  %v2755_v42 = vpop.eup %2754  ;;  %2064 = vst [vmem:[%s3414_s4 + $0x398] sm:$0xff] %v1936_v33  ;;  %v1841_v56 = vmul.f32 %v2753_v15, %v3934_v12  ;;  %2766 = vpow2.f32 %v1353_v22  ;;  %v1545_v20 = vmul.f32 1.442695, %v1299_v16 }
 0x166   : > { %v2757_v49 = vpop.eup %2756  ;;  %v1873_v44 = vmul.f32 %v2755_v42, %v3937_v35  ;;  %2768 = vrcp.f32 %v1586_v46  ;;  %v1355_v13 = vmul.f32 1.442695, %v1204_v45 }
 0x167   : > { %v2759_v51 = vpop.eup %2758  ;;  %1969 = vst [vmem:[%s3414_s4 + $0xa0] sm:$0xff] %v1841_v56  ;;  %v1905_v54 = vmul.f32 %v2757_v49, %v3951_v3  ;;  %2770 = vpow2.f32 %v1417_v24  ;;  %v1419_v59 = vmul.f32 1.442695, %v1236_v37  ;;  %v1058_v12 = vpop.f32.mrf.mxu2 }
 0x168   : > { %v2761_v52 = vpop.eup %2760  ;;  %2001 = vst [vmem:[%s3414_s4 + $0x1a0] sm:$0xff] %v1873_v44  ;;  %v1618_v38 = vadd.f32 1.0, %v2759_v51  ;;  %2772 = vpow2.f32 %v1481_v31  ;;  %v1154_v63 = vpop.f32.mrf.mxu3  ;;  %v4028_v35 = vadd.f32 %v3997_v36, %v1058_v12 }
 0x169   : > { %v2763_v1 = vpop.eup %2762  ;;  %2033 = vst [vmem:[%s3414_s4 + $0x2a0] sm:$0xff] %v1905_v54  ;;  %v1937_v47 = vmul.f32 %v2761_v52, %v3954_v25  ;;  %2774 = vpow2.f32 %v1545_v20  ;;  %v4031_v3 = vadd.f32 %v3997_v36, %v1154_v63  ;;  %v869_v19 = vpop.f32.mrf.mxu0 }
 0x16a   : > { %v965_v34 = vpop.f32.mrf.mxu1  ;;  %v2765_v48 = vpop.eup %2764  ;;  %2776 = vrcp.f32 %v1618_v38  ;;  %v1650_v11 = vadd.f32 1.0, %v2763_v1  ;;  %v4034_v6 = vadd.f32 %v3997_v36, %v869_v19  ;;  %v1268_v27 = vsub.f32 0.0, %v4028_v35 }
 0x16b   : > { %v4037_v58 = vadd.f32 %v3997_v36, %v965_v34  ;;  %v2767_v14 = vpop.eup %2766  ;;  %2065 = vst [vmem:[%s3414_s4 + $0x3a0] sm:$0xff] %v1937_v47  ;;  %v1682_v25 = vadd.f32 1.0, %v2765_v48  ;;  %2778 = vpow2.f32 %v1355_v13  ;;  %v1300_v9 = vsub.f32 0.0, %v4031_v3 }
 0x16c   : > { %v2769_v43 = vpop.eup %2768  ;;  %2780 = vrcp.f32 %v1650_v11  ;;  %v1587_v39 = vadd.f32 1.0, %v2767_v14  ;;  %v1205_v2 = vsub.f32 0.0, %v4034_v6  ;;  %v1483_v32 = vmul.f32 1.442695, %v1268_v27 }
 0x16d   : > { %v1237_v18 = vsub.f32 0.0, %v4037_v58  ;;  %v2771_v17 = vpop.eup %2770  ;;  %v1842_v30 = vmul.f32 %v2769_v43, %v3958_v61  ;;  %2782 = vrcp.f32 %v1682_v25  ;;  %v1547_v28 = vmul.f32 1.442695, %v1300_v9 }
 0x16e   : > { %v2773_v21 = vpop.eup %2772  ;;  %2784 = vrcp.f32 %v1587_v39  ;;  %v1619_v22 = vadd.f32 1.0, %v2771_v17  ;;  %v1357_v4 = vmul.f32 1.442695, %v1205_v2 }
 0x16f   : > { %v2775_v24 = vpop.eup %2774  ;;  %1970 = vst [vmem:[%s3414_s4 + $0xa8] sm:$0xff] %v1842_v30  ;;  %v1651_v26 = vadd.f32 1.0, %v2773_v21  ;;  %2786 = vpow2.f32 %v1419_v59  ;;  %v1421_v8 = vmul.f32 1.442695, %v1237_v18  ;;  %v1061_v5 = vpop.f32.mrf.mxu2 }
 0x170   : > { %v2777_v41 = vpop.eup %2776  ;;  %2788 = vrcp.f32 %v1619_v22  ;;  %v1683_v29 = vadd.f32 1.0, %v2775_v24  ;;  %v1157_v55 = vpop.f32.mrf.mxu3  ;;  %v4048_v53 = vadd.f32 %v3997_v36, %v1061_v5 }
 0x171   : > { %v2779_v33 = vpop.eup %2778  ;;  %v1874_v61 = vmul.f32 %v2777_v41, %v3967_v10  ;;  %2790 = vrcp.f32 %v1651_v26  ;;  %v4051_v16 = vadd.f32 %v3997_v36, %v1157_v55  ;;  %v872_v15 = vpop.f32.mrf.mxu0 }
 0x172   : > { %v968_v46 = vpop.f32.mrf.mxu1  ;;  %v2781_v45 = vpop.eup %2780  ;;  %2792 = vrcp.f32 %v1683_v29  ;;  %v1588_v37 = vadd.f32 1.0, %v2779_v33  ;;  %v4054_v42 = vadd.f32 %v3997_v36, %v872_v15  ;;  %v1269_v20 = vsub.f32 0.0, %v4048_v53 }
 0x173   : > { %v4057_v56 = vadd.f32 %v3997_v36, %v968_v46  ;;  %v2783_v10 = vpop.eup %2782  ;;  %2002 = vst [vmem:[%s3414_s4 + $0x1a8] sm:$0xff] %v1874_v61  ;;  %v1906_v31 = vmul.f32 %v2781_v45, %v3977_v0  ;;  %2794 = vpow2.f32 %v1483_v32  ;;  %v1301_v49 = vsub.f32 0.0, %v4051_v16 }
 0x174   : > { %v2785_v44 = vpop.eup %2784  ;;  %v1938_v51 = vmul.f32 %v2783_v10, %v3980_v57  ;;  %2796 = vrcp.f32 %v1588_v37  ;;  %v1206_v54 = vsub.f32 0.0, %v4054_v42  ;;  %v1485_v0 = vmul.f32 1.442695, %v1269_v20 }
 0x175   : > { %v1238_v13 = vsub.f32 0.0, %v4057_v56  ;;  %v2787_v52 = vpop.eup %2786  ;;  %2034 = vst [vmem:[%s3414_s4 + $0x2a8] sm:$0xff] %v1906_v31  ;;  %v1843_v38 = vmul.f32 %v2785_v44, %v3983_v60  ;;  %2798 = vpow2.f32 %v1547_v28  ;;  %v1549_v63 = vmul.f32 1.442695, %v1301_v49 }
 0x176   : > { %v2789_v59 = vpop.eup %2788  ;;  %2066 = vst [vmem:[%s3414_s4 + $0x3a8] sm:$0xff] %v1938_v51  ;;  %v1620_v12 = vadd.f32 1.0, %v2787_v52  ;;  %2800 = vpow2.f32 %v1357_v4  ;;  %v1359_v47 = vmul.f32 1.442695, %v1206_v54 }
 0x177   : > { %v2791_v1 = vpop.eup %2790  ;;  %1971 = vst [vmem:[%s3414_s4 + $0xb0] sm:$0xff] %v1843_v38  ;;  %v1875_v57 = vmul.f32 %v2789_v59, %v3986_v50  ;;  %2802 = vpow2.f32 %v1421_v8  ;;  %v1423_v60 = vmul.f32 1.442695, %v1238_v13  ;;  %v1064_v48 = vpop.f32.mrf.mxu2 }
 0x178   : > { %v2793_v19 = vpop.eup %2792  ;;  %v1907_v34 = vmul.f32 %v2791_v1, %v4000_v62  ;;  %2804 = vrcp.f32 %v1620_v12  ;;  %v1160_v11 = vpop.f32.mrf.mxu3  ;;  %v4075_v27 = vadd.f32 %v3997_v36, %v1064_v48 }
 0x179   : > { %v2795_v14 = vpop.eup %2794  ;;  %2003 = vst [vmem:[%s3414_s4 + $0x1b0] sm:$0xff] %v1875_v57  ;;  %v1939_v25 = vmul.f32 %v2793_v19, %v4003_v7  ;;  %2806 = vpow2.f32 %v1485_v0  ;;  %v4078_v50 = vadd.f32 %v3997_v36, %v1160_v11  ;;  %v875_v9 = vpop.f32.mrf.mxu0 }
 0x17a   : > { %v971_v43 = vpop.f32.mrf.mxu1  ;;  %v2797_v39 = vpop.eup %2796  ;;  %2035 = vst [vmem:[%s3414_s4 + $0x2b0] sm:$0xff] %v1907_v34  ;;  %v1652_v62 = vadd.f32 1.0, %v2795_v14  ;;  %2808 = vpow2.f32 %v1549_v63  ;;  %v4082_v2 = vadd.f32 %v3997_v36, %v875_v9  ;;  %v1270_v30 = vsub.f32 0.0, %v4075_v27 }
 0x17b   : > { %v4085_v18 = vadd.f32 %v3997_v36, %v971_v43  ;;  %v2799_v7 = vpop.eup %2798  ;;  %2067 = vst [vmem:[%s3414_s4 + $0x3b0] sm:$0xff] %v1939_v25  ;;  %v1844_v17 = vmul.f32 %v2797_v39, %v4007_v40  ;;  %2810 = vpow2.f32 %v1359_v47  ;;  %v1302_v21 = vsub.f32 0.0, %v4078_v50 }
 0x17c   : > { %v2801_v22 = vpop.eup %2800  ;;  %2812 = vrcp.f32 %v1652_v62  ;;  %v1684_v24 = vadd.f32 1.0, %v2799_v7  ;;  %v1207_v26 = vsub.f32 0.0, %v4082_v2  ;;  %v1487_v29 = vmul.f32 1.442695, %v1270_v30 }
 0x17d   : > { %v1239_v32 = vsub.f32 0.0, %v4085_v18  ;;  %v2803_v28 = vpop.eup %2802  ;;  %1972 = vst [vmem:[%s3414_s4 + $0xb8] sm:$0xff] %v1844_v17  ;;  %v1589_v41 = vadd.f32 1.0, %v2801_v22  ;;  %2814 = vpow2.f32 %v1423_v60  ;;  %v1551_v55 = vmul.f32 1.442695, %v1302_v21 }
 0x17e   : > { %v2805_v4 = vpop.eup %2804  ;;  %2816 = vrcp.f32 %v1684_v24  ;;  %v1621_v40 = vadd.f32 1.0, %v2803_v28  ;;  %v1361_v15 = vmul.f32 1.442695, %v1207_v26 }
 0x17f   : > { %v2807_v8 = vpop.eup %2806  ;;  %v1876_v5 = vmul.f32 %v2805_v4, %v4010_v23  ;;  %2818 = vrcp.f32 %v1589_v41  ;;  %v1425_v46 = vmul.f32 1.442695, %v1239_v32  ;;  %v1067_v45 = vpop.f32.mrf.mxu2 }
 0x180   : > { %v2809_v33 = vpop.eup %2808  ;;  %2820 = vrcp.f32 %v1621_v40  ;;  %v1653_v61 = vadd.f32 1.0, %v2807_v8  ;;  %v1163_v37 = vpop.f32.mrf.mxu3  ;;  %v4097_v20 = vadd.f32 %v3997_v36, %v1067_v45 }
 0x181   : > { %v2811_v10 = vpop.eup %2810  ;;  %2004 = vst [vmem:[%s3414_s4 + $0x1b8] sm:$0xff] %v1876_v5  ;;  %v1685_v31 = vadd.f32 1.0, %v2809_v33  ;;  %2822 = vpow2.f32 %v1487_v29  ;;  %v4100_v49 = vadd.f32 %v3997_v36, %v1163_v37  ;;  %v878_v23 = vpop.f32.mrf.mxu0 }
 0x182   : > { %v974_v44 = vpop.f32.mrf.mxu1  ;;  %v2813_v51 = vpop.eup %2812  ;;  %2824 = vrcp.f32 %v1653_v61  ;;  %v1590_v54 = vadd.f32 1.0, %v2811_v10  ;;  %v4103_v13 = vadd.f32 %v3997_v36, %v878_v23  ;;  %v1271_v59 = vsub.f32 0.0, %v4097_v20 }
 0x183   : > { %v4106_v52 = vadd.f32 %v3997_v36, %v974_v44  ;;  %v2815_v38 = vpop.eup %2814  ;;  %v1908_v0 = vmul.f32 %v2813_v51, %v4028_v35  ;;  %2826 = vrcp.f32 %v1685_v31  ;;  %v1303_v12 = vsub.f32 0.0, %v4100_v49 }
 0x184   : > { %v2817_v63 = vpop.eup %2816  ;;  %2828 = vrcp.f32 %v1590_v54  ;;  %v1622_v1 = vadd.f32 1.0, %v2815_v38  ;;  %v1208_v57 = vsub.f32 0.0, %v4103_v13  ;;  %v1489_v35 = vmul.f32 1.442695, %v1271_v59 }
 0x185   : > { %v1240_v47 = vsub.f32 0.0, %v4106_v52  ;;  %v2819_v19 = vpop.eup %2818  ;;  %2036 = vst [vmem:[%s3414_s4 + $0x2b8] sm:$0xff] %v1908_v0  ;;  %v1940_v34 = vmul.f32 %v2817_v63, %v4031_v3  ;;  %2830 = vpow2.f32 %v1551_v55  ;;  %v1553_v25 = vmul.f32 1.442695, %v1303_v12 }
 0x186   : > { %v2821_v60 = vpop.eup %2820  ;;  %v1845_v48 = vmul.f32 %v2819_v19, %v4034_v6  ;;  %2832 = vrcp.f32 %v1622_v1  ;;  %v1363_v39 = vmul.f32 1.442695, %v1208_v57 }
 0x187   : > { %v2823_v11 = vpop.eup %2822  ;;  %2068 = vst [vmem:[%s3414_s4 + $0x3b8] sm:$0xff] %v1940_v34  ;;  %v1877_v14 = vmul.f32 %v2821_v60, %v4037_v58  ;;  %2834 = vpow2.f32 %v1361_v15  ;;  %v1427_v62 = vmul.f32 1.442695, %v1240_v47  ;;  %v1070_v3 = vpop.f32.mrf.mxu2 }
 0x188   : > { %v2825_v9 = vpop.eup %2824  ;;  %1973 = vst [vmem:[%s3414_s4 + $0xc0] sm:$0xff] %v1845_v48  ;;  %v1654_v43 = vadd.f32 1.0, %v2823_v11  ;;  %2836 = vpow2.f32 %v1425_v46  ;;  %v1166_v7 = vpop.f32.mrf.mxu3  ;;  %v4122_v30 = vadd.f32 %v3997_v36, %v1070_v3 }
 0x189   : > { %v2827_v17 = vpop.eup %2826  ;;  %2005 = vst [vmem:[%s3414_s4 + $0x1c0] sm:$0xff] %v1877_v14  ;;  %v1909_v6 = vmul.f32 %v2825_v9, %v4048_v53  ;;  %2838 = vpow2.f32 %v1489_v35  ;;  %v4125_v58 = vadd.f32 %v3997_v36, %v1166_v7  ;;  %v881_v21 = vpop.f32.mrf.mxu0 }
 0x18a   : > { %v977_v22 = vpop.f32.mrf.mxu1  ;;  %v2829_v24 = vpop.eup %2828  ;;  %v1941_v26 = vmul.f32 %v2827_v17, %v4051_v16  ;;  %2840 = vrcp.f32 %v1654_v43  ;;  %v4129_v32 = vadd.f32 %v3997_v36, %v881_v21  ;;  %v1272_v41 = vsub.f32 0.0, %v4122_v30 }
 0x18b   : > { %v2831_v28 = vpop.eup %2830  ;;  %2037 = vst [vmem:[%s3414_s4 + $0x2c0] sm:$0xff] %v1909_v6  ;;  %v1846_v53 = vmul.f32 %v2829_v24, %v4054_v42  ;;  %2842 = vpow2.f32 %v1553_v25  ;;  %v1304_v29 = vsub.f32 0.0, %v4125_v58  ;;  %v4138_v8 = vadd.f32 %v3997_v36, %v977_v22 }
 0x18c   : > { %v2833_v4 = vpop.eup %2832  ;;  %2069 = vst [vmem:[%s3414_s4 + $0x3c0] sm:$0xff] %v1941_v26  ;;  %v1686_v40 = vadd.f32 1.0, %v2831_v28  ;;  %2844 = vpow2.f32 %v1363_v39  ;;  %v1209_v16 = vsub.f32 0.0, %v4129_v32  ;;  %v1491_v42 = vmul.f32 1.442695, %v1272_v41 }
 0x18d   : > { %v2835_v5 = vpop.eup %2834  ;;  %1974 = vst [vmem:[%s3414_s4 + $0xc8] sm:$0xff] %v1846_v53  ;;  %v1878_v55 = vmul.f32 %v2833_v4, %v4057_v56  ;;  %2846 = vpow2.f32 %v1427_v62  ;;  %v1555_v45 = vmul.f32 1.442695, %v1304_v29  ;;  %v1241_v23 = vsub.f32 0.0, %v4138_v8 }
 0x18e   : > { %v2837_v33 = vpop.eup %2836  ;;  %2848 = vrcp.f32 %v1686_v40  ;;  %v1591_v61 = vadd.f32 1.0, %v2835_v5  ;;  %v1365_v31 = vmul.f32 1.442695, %v1209_v16 }
 0x18f   : > { %v2839_v15 = vpop.eup %2838  ;;  %2006 = vst [vmem:[%s3414_s4 + $0x1c8] sm:$0xff] %v1878_v55  ;;  %v1623_v46 = vadd.f32 1.0, %v2837_v33  ;;  %2850 = vpow2.f32 %v1491_v42  ;;  %v1073_v44 = vpop.f32.mrf.mxu2  ;;  %v1429_v9 = vmul.f32 1.442695, %v1241_v23 }
 0x190   : > { %v2841_v37 = vpop.eup %2840  ;;  %2852 = vrcp.f32 %v1591_v61  ;;  %v1655_v10 = vadd.f32 1.0, %v2839_v15  ;;  %v1169_v51 = vpop.f32.mrf.mxu3  ;;  %v4146_v38 = vadd.f32 %v3997_v36, %v1073_v44 }
 0x191   : > { %v2843_v56 = vpop.eup %2842  ;;  %v1910_v54 = vmul.f32 %v2841_v37, %v4075_v27  ;;  %2854 = vrcp.f32 %v1623_v46  ;;  %v4149_v0 = vadd.f32 %v3997_v36, %v1169_v51  ;;  %v884_v59 = vpop.f32.mrf.mxu0 }
 0x192   : > { %v980_v12 = vpop.f32.mrf.mxu1  ;;  %v2845_v63 = vpop.eup %2844  ;;  %2856 = vrcp.f32 %v1655_v10  ;;  %v1687_v1 = vadd.f32 1.0, %v2843_v56  ;;  %v4152_v57 = vadd.f32 %v3997_v36, %v884_v59  ;;  %v1273_v34 = vsub.f32 0.0, %v4146_v38 }
 0x193   : > { %v4155_v47 = vadd.f32 %v3997_v36, %v980_v12  ;;  %v2847_v19 = vpop.eup %2846  ;;  %2038 = vst [vmem:[%s3414_s4 + $0x2c8] sm:$0xff] %v1910_v54  ;;  %v1592_v27 = vadd.f32 1.0, %v2845_v63  ;;  %2858 = vpow2.f32 %v1555_v45  ;;  %v1305_v35 = vsub.f32 0.0, %v4149_v0 }
 0x194   : > { %v2849_v60 = vpop.eup %2848  ;;  %2860 = vrcp.f32 %v1687_v1  ;;  %v1624_v48 = vadd.f32 1.0, %v2847_v19  ;;  %v1210_v11 = vsub.f32 0.0, %v4152_v57  ;;  %v1493_v62 = vmul.f32 1.442695, %v1273_v34 }
 0x195   : > { %v2851_v14 = vpop.eup %2850  ;;  %v1942_v25 = vmul.f32 %v2849_v60, %v4078_v50  ;;  %2862 = vrcp.f32 %v1592_v27  ;;  %v1242_v3 = vsub.f32 0.0, %v4155_v47  ;;  %v1557_v6 = vmul.f32 1.442695, %v1305_v35 }
 0x196   : > { %v2853_v43 = vpop.eup %2852  ;;  %2864 = vrcp.f32 %v1624_v48  ;;  %v1656_v39 = vadd.f32 1.0, %v2851_v14  ;;  %v1367_v50 = vmul.f32 1.442695, %v1210_v11 }
 0x197   : > { %v2855_v7 = vpop.eup %2854  ;;  %2070 = vst [vmem:[%s3414_s4 + $0x3c8] sm:$0xff] %v1942_v25  ;;  %v1847_v17 = vmul.f32 %v2853_v43, %v4082_v2  ;;  %2866 = vpow2.f32 %v1365_v31  ;;  %v1076_v24 = vpop.f32.mrf.mxu2  ;;  %v1431_v16 = vmul.f32 1.442695, %v1242_v3 }
 0x198   : > { %v2857_v21 = vpop.eup %2856  ;;  %v1879_v22 = vmul.f32 %v2855_v7, %v4085_v18  ;;  %2868 = vrcp.f32 %v1656_v39  ;;  %v1172_v26 = vpop.f32.mrf.mxu3  ;;  %v4169_v41 = vadd.f32 %v3997_v36, %v1076_v24 }
 0x199   : > { %v2859_v28 = vpop.eup %2858  ;;  %1975 = vst [vmem:[%s3414_s4 + $0xd0] sm:$0xff] %v1847_v17  ;;  %v1911_v53 = vmul.f32 %v2857_v21, %v4097_v20  ;;  %2870 = vpow2.f32 %v1429_v9  ;;  %v4172_v2 = vadd.f32 %v3997_v36, %v1172_v26  ;;  %v887_v29 = vpop.f32.mrf.mxu0 }
 0x19a   : > { %v983_v4 = vpop.f32.mrf.mxu1  ;;  %v2861_v40 = vpop.eup %2860  ;;  %2007 = vst [vmem:[%s3414_s4 + $0x1d0] sm:$0xff] %v1879_v22  ;;  %v1688_v18 = vadd.f32 1.0, %v2859_v28  ;;  %2872 = vpow2.f32 %v1493_v62  ;;  %v4176_v5 = vadd.f32 %v3997_v36, %v887_v29  ;;  %v1274_v42 = vsub.f32 0.0, %v4169_v41 }
 0x19b   : > { %v2863_v55 = vpop.eup %2862  ;;  %2039 = vst [vmem:[%s3414_s4 + $0x2d0] sm:$0xff] %v1911_v53  ;;  %v1943_v20 = vmul.f32 %v2861_v40, %v4100_v49  ;;  %2874 = vpow2.f32 %v1557_v6  ;;  %v1306_v33 = vsub.f32 0.0, %v4172_v2  ;;  %v4185_v45 = vadd.f32 %v3997_v36, %v983_v4 }
 0x19c   : > { %v2865_v61 = vpop.eup %2864  ;;  %v1848_v15 = vmul.f32 %v2863_v55, %v4103_v13  ;;  %2876 = vrcp.f32 %v1688_v18  ;;  %v1211_v46 = vsub.f32 0.0, %v4176_v5  ;;  %v1495_v10 = vmul.f32 1.442695, %v1274_v42 }
 0x19d   : > { %v2867_v37 = vpop.eup %2866  ;;  %2071 = vst [vmem:[%s3414_s4 + $0x3d0] sm:$0xff] %v1943_v20  ;;  %v1880_v49 = vmul.f32 %v2865_v61, %v4106_v52  ;;  %2878 = vpow2.f32 %v1367_v50  ;;  %v1559_v31 = vmul.f32 1.442695, %v1306_v33  ;;  %v1243_v12 = vsub.f32 0.0, %v4185_v45 }
 0x19e   : > { %v2869_v23 = vpop.eup %2868  ;;  %1976 = vst [vmem:[%s3414_s4 + $0xd8] sm:$0xff] %v1848_v15  ;;  %v1593_v44 = vadd.f32 1.0, %v2867_v37  ;;  %2880 = vpow2.f32 %v1431_v16  ;;  %v1369_v59 = vmul.f32 1.442695, %v1211_v46 }
 0x19f   : > { %v2871_v51 = vpop.eup %2870  ;;  %2008 = vst [vmem:[%s3414_s4 + $0x1d8] sm:$0xff] %v1880_v49  ;;  %v1912_v13 = vmul.f32 %v2869_v23, %v4122_v30  ;;  %2882 = vpow2.f32 %v1495_v10  ;;  %v1079_v52 = vpop.f32.mrf.mxu2  ;;  %v1433_v21 = vmul.f32 1.442695, %v1243_v12 }
 0x1a0   : > { %v2873_v56 = vpop.eup %2872  ;;  %2884 = vrcp.f32 %v1593_v44  ;;  %v1625_v54 = vadd.f32 1.0, %v2871_v51  ;;  %v1175_v63 = vpop.f32.mrf.mxu3  ;;  %v4195_v27 = vadd.f32 %v3997_v36, %v1079_v52 }
 0x1a1   : > { %v2875_v1 = vpop.eup %2874  ;;  %2040 = vst [vmem:[%s3414_s4 + $0x2d8] sm:$0xff] %v1912_v13  ;;  %v1657_v19 = vadd.f32 1.0, %v2873_v56  ;;  %2886 = vpow2.f32 %v1559_v31  ;;  %v4198_v34 = vadd.f32 %v3997_v36, %v1175_v63  ;;  %v890_v30 = vpop.f32.mrf.mxu0 }
 0x1a2   : > { %v986_v35 = vpop.f32.mrf.mxu1  ;;  %v2877_v60 = vpop.eup %2876  ;;  %2888 = vrcp.f32 %v1625_v54  ;;  %v1689_v48 = vadd.f32 1.0, %v2875_v1  ;;  %v4201_v11 = vadd.f32 %v3997_v36, %v890_v30  ;;  %v1275_v43 = vsub.f32 0.0, %v4195_v27 }
 0x1a3   : > { %v4204_v14 = vadd.f32 %v3997_v36, %v986_v35  ;;  %v2879_v25 = vpop.eup %2878  ;;  %v1944_v9 = vmul.f32 %v2877_v60, %v4125_v58  ;;  %2890 = vrcp.f32 %v1657_v19  ;;  %v1307_v3 = vsub.f32 0.0, %v4198_v34 }
 0x1a4   : > { %v2881_v39 = vpop.eup %2880  ;;  %2892 = vrcp.f32 %v1689_v48  ;;  %v1594_v62 = vadd.f32 1.0, %v2879_v25  ;;  %v1212_v7 = vsub.f32 0.0, %v4201_v11  ;;  %v1497_v28 = vmul.f32 1.442695, %v1275_v43 }
 0x1a5   : > { %v2883_v17 = vpop.eup %2882  ;;  %2072 = vst [vmem:[%s3414_s4 + $0x3d8] sm:$0xff] %v1944_v9  ;;  %v1626_v6 = vadd.f32 1.0, %v2881_v39  ;;  %2894 = vpow2.f32 %v1369_v59  ;;  %v1244_v58 = vsub.f32 0.0, %v4204_v14  ;;  %v1561_v4 = vmul.f32 1.442695, %v1307_v3 }
 0x1a6   : > { %v2885_v22 = vpop.eup %2884  ;;  %2896 = vrcp.f32 %v1594_v62  ;;  %v1658_v50 = vadd.f32 1.0, %v2883_v17  ;;  %v1371_v40 = vmul.f32 1.442695, %v1212_v7 }
 0x1a7   : > { %v2887_v24 = vpop.eup %2886  ;;  %v1849_v26 = vmul.f32 %v2885_v22, %v4129_v32  ;;  %2898 = vrcp.f32 %v1626_v6  ;;  %v1082_v18 = vpop.f32.mrf.mxu2  ;;  %v1435_v15 = vmul.f32 1.442695, %v1244_v58 }
 0x1a8   : > { %v2889_v53 = vpop.eup %2888  ;;  %2900 = vrcp.f32 %v1658_v50  ;;  %v1690_v29 = vadd.f32 1.0, %v2887_v24  ;;  %v1178_v16 = vpop.f32.mrf.mxu3  ;;  %v4216_v42 = vadd.f32 %v3997_v36, %v1082_v18 }
 0x1a9   : > { %v2891_v55 = vpop.eup %2890  ;;  %1977 = vst [vmem:[%s3414_s4 + $0xe0] sm:$0xff] %v1849_v26  ;;  %v1881_v20 = vmul.f32 %v2889_v53, %v4138_v8  ;;  %2902 = vpow2.f32 %v1433_v21  ;;  %v4219_v32 = vadd.f32 %v3997_v36, %v1178_v16 }
 0x1aa   : > { %v2893_v33 = vpop.eup %2892  ;;  %v1913_v61 = vmul.f32 %v2891_v55, %v4146_v38  ;;  %2904 = vrcp.f32 %v1690_v29  ;;  %v1276_v8 = vsub.f32 0.0, %v4216_v42 }
 0x1ab   : > { %v2895_v46 = vpop.eup %2894  ;;  %2009 = vst [vmem:[%s3414_s4 + $0x1e0] sm:$0xff] %v1881_v20  ;;  %v1945_v37 = vmul.f32 %v2893_v33, %v4149_v0  ;;  %2906 = vpow2.f32 %v1497_v28  ;;  %v1308_v49 = vsub.f32 0.0, %v4219_v32 }
 0x1ac   : > { %v2897_v10 = vpop.eup %2896  ;;  %2041 = vst [vmem:[%s3414_s4 + $0x2e0] sm:$0xff] %v1913_v61  ;;  %v1595_v36 = vadd.f32 1.0, %v2895_v46  ;;  %2908 = vpow2.f32 %v1561_v4  ;;  %v1499_v23 = vmul.f32 1.442695, %v1276_v8 }
 0x1ad   : > { %v2899_v31 = vpop.eup %2898  ;;  %2073 = vst [vmem:[%s3414_s4 + $0x3e0] sm:$0xff] %v1945_v37  ;;  %v1850_v38 = vmul.f32 %v2897_v10, %v4152_v57  ;;  %2910 = vpow2.f32 %v1371_v40  ;;  %v1563_v44 = vmul.f32 1.442695, %v1308_v49 }
 0x1ae   : > { %v2901_v0 = vpop.eup %2900  ;;  %v1882_v51 = vmul.f32 %v2899_v31, %v4155_v47  ;;  %2912 = vrcp.f32 %v1595_v36 }
 0x1af   : > { %v2903_v13 = vpop.eup %2902  ;;  %1978 = vst [vmem:[%s3414_s4 + $0xe8] sm:$0xff] %v1850_v38  ;;  %v1914_v56 = vmul.f32 %v2901_v0, %v4169_v41  ;;  %2914 = vpow2.f32 %v1435_v15 }
 0x1b0   : > { %v2905_v54 = vpop.eup %2904  ;;  %2010 = vst [vmem:[%s3414_s4 + $0x1e8] sm:$0xff] %v1882_v51  ;;  %v1627_v59 = vadd.f32 1.0, %v2903_v13  ;;  %2916 = vpow2.f32 %v1499_v23 }
 0x1b1   : > { %v2907_v12 = vpop.eup %2906  ;;  %2042 = vst [vmem:[%s3414_s4 + $0x2e8] sm:$0xff] %v1914_v56  ;;  %v1946_v57 = vmul.f32 %v2905_v54, %v4172_v2  ;;  %2918 = vpow2.f32 %v1563_v44 }
 0x1b2   : > { %v2909_v52 = vpop.eup %2908  ;;  %2920 = vrcp.f32 %v1627_v59  ;;  %v1659_v47 = vadd.f32 1.0, %v2907_v12 }
 0x1b3   : > { %v2911_v63 = vpop.eup %2910  ;;  %2074 = vst [vmem:[%s3414_s4 + $0x3e8] sm:$0xff] %v1946_v57  ;;  %v1691_v1 = vadd.f32 1.0, %v2909_v52 }
 0x1b4   : > { %v2913_v19 = vpop.eup %2912  ;;  %2922 = vrcp.f32 %v1659_v47  ;;  %v1596_v41 = vadd.f32 1.0, %v2911_v63 }
 0x1b5   : > { %v2915_v30 = vpop.eup %2914  ;;  %v1851_v35 = vmul.f32 %v2913_v19, %v4176_v5  ;;  %2924 = vrcp.f32 %v1691_v1 }
 0x1b6   : > { %v2917_v60 = vpop.eup %2916  ;;  %2926 = vrcp.f32 %v1596_v41  ;;  %v1628_v48 = vadd.f32 1.0, %v2915_v30 }
 0x1b7   : > { %v2919_v2 = vpop.eup %2918  ;;  %1979 = vst [vmem:[%s3414_s4 + $0xf0] sm:$0xff] %v1851_v35  ;;  %v1660_v25 = vadd.f32 1.0, %v2917_v60 }
 0x1b8   : > { %v2921_v9 = vpop.eup %2920  ;;  %2928 = vrcp.f32 %v1628_v48  ;;  %v1692_v43 = vadd.f32 1.0, %v2919_v2 }
 0x1b9   : > { %v1883_v39 = vmul.f32 %v2921_v9, %v4185_v45  ;;  %2930 = vrcp.f32 %v1660_v25 }
 0x1ba   : > { %v2923_v62 = vpop.eup %2922  ;;  %2932 = vrcp.f32 %v1692_v43 }
 0x1bb   : > { %v2925_v5 = vpop.eup %2924  ;;  %2011 = vst [vmem:[%s3414_s4 + $0x1f0] sm:$0xff] %v1883_v39  ;;  %v1915_v3 = vmul.f32 %v2923_v62, %v4195_v27 }
 0x1bc   : > { %v2927_v7 = vpop.eup %2926  ;;  %v1947_v17 = vmul.f32 %v2925_v5, %v4198_v34 }
 0x1bd   : > { %2043 = vst [vmem:[%s3414_s4 + $0x2f0] sm:$0xff] %v1915_v3  ;;  %v1852_v6 = vmul.f32 %v2927_v7, %v4201_v11 }
 0x1be   : > { %v2929_v21 = vpop.eup %2928  ;;  %2075 = vst [vmem:[%s3414_s4 + $0x3f0] sm:$0xff] %v1947_v17 }
 0x1bf   : > { %v2931_v22 = vpop.eup %2930  ;;  %1980 = vst [vmem:[%s3414_s4 + $0xf8] sm:$0xff] %v1852_v6  ;;  %v1884_v45 = vmul.f32 %v2929_v21, %v4204_v14 }
 0x1c0   : > { %v2933_v50 = vpop.eup %2932  ;;  %v1916_v58 = vmul.f32 %v2931_v22, %v4216_v42 }
 0x1c1   : > { %2012 = vst [vmem:[%s3414_s4 + $0x1f8] sm:$0xff] %v1884_v45  ;;  %v1948_v24 = vmul.f32 %v2933_v50, %v4219_v32 }
 0x1c2   : > { %2044 = vst [vmem:[%s3414_s4 + $0x2f8] sm:$0xff] %v1916_v58 }
 0x1c3   : > { %2076 = vst [vmem:[%s3414_s4 + $0x3f8] sm:$0xff] %v1948_v24 }
 0x1c4 PF: > { %s17_s17 = sadd.s32 1, %s3080_s17   ;;  %s4279_s12 = smov %s3064_s13 }
 0x1c5   : > { %p14_p2 = scmp.ge.s32.totalorder %s17_s17, 4   ;;  %s4280_s13 = smov %s3068_s14 }
 0x1c6   : > { %s4281_s14 = smov %s3182_s21  ;;  %s4282_s15 = smov %s3076_s16 }
 0x1c7   : > { %s4283_s16 = smov %s4285_s7  ;;  %16 = sbr.rel (!%p14_p2) target bundleno = 5 (0x5), region = 82 }
 0x1cc   :  { %2105 = vsyncpa [#allocation3], 1 }
 0x1cd   :  { %2107 = vsyncpa [#allocation3 + $0x1], 1 }
 0x1ce   :  { %2108 = vsyncpa [#allocation5], 1 }

</bundles_post_ra>
